<compile_context>
chip_gen: v6e
topology: v6e:2x2x1
jax: 0.10.0
libtpu: 0.0.40
codegen_flags: <defaults>
</compile_context>

<pallas_src>
import functools

import jax
import jax.numpy as jnp
from jax.experimental import pallas as pl
from jax.experimental.pallas import tpu as pltpu


def _pick_sublane_fold(ft):
    """Largest sublane fold SUB in {8,4,2,1} with (ft/SUB) a multiple of 128."""
    for sub in (8, 4, 2, 1):
        if ft % (sub * 128) == 0:
            return sub
    raise ValueError(f"spectrogram element count {ft} must be a multiple of 128")


def _pick_lane_tile(lf):
    """Lane-tile width: largest of (512,256,128) dividing lf (keeps acc in vregs)."""
    for lt in (512, 256, 128):
        if lf % lt == 0:
            return lt
    return lf


# ---------------------------------------------------------------------------
# Fused kernel: frame features + sound net + L1 criterion.
# One grid step = one FT lane-tile; all N mixtures handled inside the body.
# ---------------------------------------------------------------------------
def fused_forward_kernel(frames_ref, mix_ref, aud_ref, wf_ref, bf_ref,
                         ws_ref, bs_ref, pred_ref, err_ref):
    """Refs for the current grid step.

    frames_ref : (NB, C, P)   f32 VMEM   (same block every step -> DMA'd once per core)
    mix_ref    : (B, SUB, L)  f32 VMEM   audio_mix tile (NOT replicated over N)
    aud_ref    : (NB, SUB, L) f32 VMEM   ground-truth spectrogram tile
    wf_ref     : (C, K)       f32 VMEM   frame 1x1-conv weight
    bf_ref     : (1, K)       f32 VMEM   frame 1x1-conv bias
    ws_ref     : (K,)         f32 SMEM   sound 1->K expansion weight (scalar reads)
    bs_ref     : (K,)         f32 SMEM   sound 1->K expansion bias   (scalar reads)
    pred_ref   : (NB, SUB, L) f32 VMEM   predicted spectrogram tile (out)
    err_ref    : (1, 1)       f32 SMEM   per-tile partial L1 sum (out)
    """
    NB, C, P = frames_ref.shape
    K = wf_ref.shape[1]
    B, SUB, L = mix_ref.shape
    N = NB // B

    # --- net_frame.forward_multiframe + img_activation (sigmoid) ------------
    # Pool-before-conv: mean_P(x @ W + b) == mean_P(x) @ W + b -> one lane reduction.
    # TODO(synk): valid only because this synthetic net_frame is linear; the real
    # injected net_frame (ResNet) is nonlinear, so drop this reorder for it.
    pooled = jnp.sum(frames_ref[...], axis=-1) * (1.0 / P)          # (NB, C)
    if C <= 8:                                                       # tiny C: VPU unroll
        lin = jnp.zeros((NB, K), jnp.float32) + bf_ref[...]
        for c in range(C):
            lin = lin + pooled[:, c:c + 1] * wf_ref[c:c + 1, :]
    else:                                                            # real C: one MXU push
        lin = jnp.dot(pooled, wf_ref[...],
                      preferred_element_type=jnp.float32) + bf_ref[...]
    feat = 1.0 / (1.0 + jnp.exp(-lin))                               # sigmoid -> (NB, K)
    # One-time relayout so the hot K-loop only lane-slices (no per-k sublane shuffles).
    feat5 = feat.reshape(N, B, 1, 1, K)

    # --- net_sound: pred[n,b] = sum_k feat[n,b,k] * relu(ws[k]*mix[b] + bs[k]) ----
    # h_k is computed ONCE per k on the (B,SUB,L) mix tile and accumulated into all
    # N mixture row blocks (mix dedup). ws/bs are SMEM scalars -> free splats.
    mix = mix_ref[...]                                               # (B, SUB, L)
    acc = jnp.zeros((N, B, SUB, L), jnp.float32)
    for k in range(K):                                               # K static, unrolled
        h = jnp.maximum(ws_ref[k] * mix + bs_ref[k], 0.0)            # (B, SUB, L), once
        wk = feat5[..., k]                                           # (N, B, 1, 1) splat
        acc = acc + wk * h[None, :, :, :]                            # (N, B, SUB, L)
    pred_tile = acc.reshape(NB, SUB, L)
    pred_ref[...] = pred_tile                                        # single lane-dense store
    # activate(pred, args.sound_activation) discards its return value in the original
    # PyTorch forward, so the sound activation is intentionally a no-op here.

    # --- crit (L1): per-tile partial sum; summed & normalized in the wrapper -----
    err_ref[0, 0] = jnp.sum(jnp.abs(pred_tile - aud_ref[...]))


# ---------------------------------------------------------------------------
# NetWrapper.forward equivalent
# ---------------------------------------------------------------------------
@functools.partial(jax.jit, static_argnames=("num_mix",))
def net_wrapper_forward(audio_mix, audios, frames, params, num_mix):
    """audio_mix: (B,A,F,T); audios: (N,B,A,F,T); frames: (N,B,C,Tf,H,W)."""
    N = num_mix
    B, A, F, T = audio_mix.shape
    _, _, C, Tf, H, W = frames.shape
    K = params["wf"].shape[1]
    P = Tf * H * W
    FT = A * F * T                 # includes the audio channel dim in the L1 divisor
    NB = N * B

    SUB = _pick_sublane_fold(FT)   # pack sublanes: (rows, FT) -> (rows, SUB, FT/SUB)
    LF = FT // SUB
    LT = _pick_lane_tile(LF)       # lane tile (multiple of 128)
    num_ft = LF // LT

    # Pure reshapes only: no transposes, no N-fold broadcast of the mix in HBM.
    frames_flat = frames.reshape(NB, C, P)
    mix_f = audio_mix.reshape(B, SUB, LF)
    aud_f = audios.reshape(NB, SUB, LF)

    cost = pl.CostEstimate(
        flops=NB * C * P + 2 * NB * C * K
              + K * (3 * B + 2 * NB) * FT + 3 * NB * FT,
        transcendentals=NB * K * num_ft,
        bytes_accessed=4 * (NB * C * P + B * FT + 2 * NB * FT
                            + C * K + 3 * K + num_ft),
    )

    pred_f, err_part = pl.pallas_call(
        fused_forward_kernel,
        out_shape=(
            jax.ShapeDtypeStruct((NB, SUB, LF), jnp.float32),
            jax.ShapeDtypeStruct((num_ft, 1), jnp.float32),
        ),
        grid=(num_ft,),
        in_specs=[
            pl.BlockSpec((NB, C, P), lambda i: (0, 0, 0)),     # frames (constant block)
            pl.BlockSpec((B, SUB, LT), lambda i: (0, 0, i)),   # mix tile (no N replication)
            pl.BlockSpec((NB, SUB, LT), lambda i: (0, 0, i)),  # audios tile
            pl.BlockSpec((C, K), lambda i: (0, 0)),            # wf
            pl.BlockSpec((1, K), lambda i: (0, 0)),            # bf
            pl.BlockSpec(memory_space=pltpu.MemorySpace.SMEM),  # ws (K,)
            pl.BlockSpec(memory_space=pltpu.MemorySpace.SMEM),  # bs (K,)
        ],
        out_specs=(
            pl.BlockSpec((NB, SUB, LT), lambda i: (0, 0, i)),  # pred tile
            pl.BlockSpec((1, 1), lambda i: (i, 0),
                         memory_space=pltpu.MemorySpace.SMEM),  # partial L1 sum
        ),
        compiler_params=pltpu.CompilerParams(
            dimension_semantics=("parallel",),   # FT tiles are independent -> v7x 2-TC
        ),
        cost_estimate=cost,
    )(frames_flat, mix_f, aud_f,
      params["wf"], params["bf"], params["ws"], params["bs"])

    # crit: mean L1 over all mixtures & elements (tiny num_ft-element reduce).
    err = (jnp.sum(err_part) * (1.0 / (NB * FT))).reshape(1)
    # Single stacked prediction tensor (free reshape; equivalent to the PyTorch list).
    pred_audios = pred_f.reshape(N, B, A, F, T)
    return err, pred_audios


# ---------------------------------------------------------------------------
# Pure-JAX reference (original op order: conv -> pool), for correctness check
# ---------------------------------------------------------------------------
def reference_forward(audio_mix, audios, frames, params, N):
    wf, bf, ws, bs = params["wf"], params["bf"], params["ws"], params["bs"]
    B = audio_mix.shape[0]
    preds = []
    for n in range(N):
        x = frames[n]                                                       # (B,C,Tf,H,W)
        xc = jnp.transpose(x, (0, 2, 3, 4, 1)).reshape(B, -1, x.shape[1])   # (B,P,C)
        h = xc @ wf + bf                                                    # (B,P,K)
        feat = jax.nn.sigmoid(jnp.mean(h, axis=1))                          # (B,K)
        mix = audio_mix.reshape(B, 1, -1)                                   # (B,1,FT)
        hk = jnp.maximum(ws[None, :, None] * mix + bs[None, :, None], 0.0)  # (B,K,FT)
        pred = jnp.sum(feat[:, :, None] * hk, axis=1)                       # (B,FT)
        preds.append(pred.reshape(audio_mix.shape))
    pred_stack = jnp.stack(preds, 0)                                        # (N,B,A,F,T)
    err = jnp.mean(jnp.abs(pred_stack - audios)).reshape(1)
    return err, pred_stack


if __name__ == "__main__":
    # Small shapes consistent with the forward pass.
    N = 2          # args.num_mix
    B = 2          # batch
    C = 3          # frame channels
    T = 3          # frames per clip
    H = W = 16     # frame spatial size
    K = 16         # visual feature channels
    F = 32         # spectrogram freq bins
    TS = 32        # spectrogram time frames

    key = jax.random.PRNGKey(0)
    k_mix, k_aud, k_frm, kw, kb, kws, kbs = jax.random.split(key, 7)
    audio_mix = jax.random.normal(k_mix, (B, 1, F, TS), dtype=jnp.float32)
    audios = jax.random.normal(k_aud, (N, B, 1, F, TS), dtype=jnp.float32)
    frames = jax.random.normal(k_frm, (N, B, C, T, H, W), dtype=jnp.float32)

    # Deterministic synthetic parameters (no checkpoint load).
    params = {
        "wf": jax.random.normal(kw, (C, K), dtype=jnp.float32) * 0.1,   # frame 1x1 conv weight
        "bf": jax.random.normal(kb, (1, K), dtype=jnp.float32) * 0.1,   # frame conv bias
        "ws": jax.random.normal(kws, (K,), dtype=jnp.float32) * 0.1,    # sound 1->K expansion weight
        "bs": jax.random.normal(kbs, (K,), dtype=jnp.float32) * 0.1,    # sound expansion bias
    }

    err, pred_audios = net_wrapper_forward(audio_mix, audios, frames, params, num_mix=N)
    jax.block_until_ready(err)
    jax.block_until_ready(pred_audios)

    # Shape + numerical checks against the pure-JAX reference.
    assert err.shape == (1,)
    assert pred_audios.shape == (N, B, 1, F, TS)
    err_ref, pred_ref = reference_forward(audio_mix, audios, frames, params, N)
    assert jnp.allclose(err, err_ref, rtol=1e-4, atol=1e-4)
    assert jnp.allclose(pred_audios, pred_ref, rtol=1e-4, atol=1e-4)

    print("KERNEL_OK")
</pallas_src>

<mosaic_0001>
module attributes {stable_mosaic.version = 11 : i64} {
  func.func @fused_forward_kernel(%arg0: i32, %arg1: memref<4x3x768xf32, #tpu.memory_space<vmem>>, %arg2: memref<2x8x128xf32, #tpu.memory_space<vmem>>, %arg3: memref<4x8x128xf32, #tpu.memory_space<vmem>>, %arg4: memref<3x16xf32, #tpu.memory_space<vmem>>, %arg5: memref<1x16xf32, #tpu.memory_space<vmem>>, %arg6: memref<16xf32, #tpu.memory_space<smem>>, %arg7: memref<16xf32, #tpu.memory_space<smem>>, %arg8: memref<4x8x128xf32, #tpu.memory_space<vmem>>, %arg9: memref<1x1xf32, #tpu.memory_space<smem>>) attributes {dimension_semantics = [#tpu.dimension_semantics<parallel>], iteration_bounds = array<i64: 1>, scalar_prefetch = 0 : i64, scratch_operands = 0 : i64, tpu.core_type = #tpu.core_type<tc>, window_params = [{pipeline_mode = #tpu.pipeline_mode<synchronous>, transform_indices = @transform_0, window_bounds = array<i64: 4, 3, 768>}, {transform_indices = @transform_1, window_bounds = array<i64: 2, 8, 128>}, {transform_indices = @transform_2, window_bounds = array<i64: 4, 8, 128>}, {pipeline_mode = #tpu.pipeline_mode<synchronous>, transform_indices = @transform_3, window_bounds = array<i64: 3, 16>}, {pipeline_mode = #tpu.pipeline_mode<synchronous>, transform_indices = @transform_4, window_bounds = array<i64: 1, 16>}, {transform_indices = @transform_5, window_bounds = array<i64: 16>}, {transform_indices = @transform_6, window_bounds = array<i64: 16>}, {transform_indices = @transform_7, window_bounds = array<i64: 4, 8, 128>}, {transform_indices = @transform_8, window_bounds = array<i64: 1, 1>}]} {
    %c0 = arith.constant 0 : index
    %c0_0 = arith.constant 0 : index
    %c0_1 = arith.constant 0 : index
    %0 = vector.load %arg1[%c0, %c0_0, %c0_1] : memref<4x3x768xf32, #tpu.memory_space<vmem>>, vector<4x3x768xf32>
    %cst = arith.constant dense<0.000000e+00> : vector<4x3xf32>
    %1 = vector.multi_reduction <add>, %0, %cst [2] : vector<4x3x768xf32> to vector<4x3xf32>
    %cst_2 = arith.constant 0.00130208337 : f32
    %2 = vector.broadcast %cst_2 : f32 to vector<4x3xf32>
    %3 = arith.mulf %1, %2 : vector<4x3xf32>
    %cst_3 = arith.constant 0.000000e+00 : f32
    %4 = vector.broadcast %cst_3 : f32 to vector<4x16xf32>
    %c0_4 = arith.constant 0 : index
    %c0_5 = arith.constant 0 : index
    %5 = vector.load %arg5[%c0_4, %c0_5] : memref<1x16xf32, #tpu.memory_space<vmem>>, vector<1x16xf32>
    %6 = vector.broadcast %5 : vector<1x16xf32> to vector<4x16xf32>
    %7 = arith.addf %4, %6 : vector<4x16xf32>
    %8 = vector.extract_strided_slice %3 {offsets = [0, 0], sizes = [4, 1], strides = [1, 1]} : vector<4x3xf32> to vector<4x1xf32>
    %c0_6 = arith.constant 0 : index
    %c0_7 = arith.constant 0 : index
    %9 = vector.load %arg4[%c0_6, %c0_7] : memref<3x16xf32, #tpu.memory_space<vmem>>, vector<1x16xf32>
    %10 = vector.broadcast %8 : vector<4x1xf32> to vector<4x16xf32>
    %11 = vector.broadcast %9 : vector<1x16xf32> to vector<4x16xf32>
    %12 = arith.mulf %10, %11 : vector<4x16xf32>
    %13 = arith.addf %7, %12 : vector<4x16xf32>
    %14 = vector.extract_strided_slice %3 {offsets = [0, 1], sizes = [4, 1], strides = [1, 1]} : vector<4x3xf32> to vector<4x1xf32>
    %c1 = arith.constant 1 : index
    %c0_8 = arith.constant 0 : index
    %15 = vector.load %arg4[%c1, %c0_8] : memref<3x16xf32, #tpu.memory_space<vmem>>, vector<1x16xf32>
    %16 = vector.broadcast %14 : vector<4x1xf32> to vector<4x16xf32>
    %17 = vector.broadcast %15 : vector<1x16xf32> to vector<4x16xf32>
    %18 = arith.mulf %16, %17 : vector<4x16xf32>
    %19 = arith.addf %13, %18 : vector<4x16xf32>
    %20 = vector.extract_strided_slice %3 {offsets = [0, 2], sizes = [4, 1], strides = [1, 1]} : vector<4x3xf32> to vector<4x1xf32>
    %c2 = arith.constant 2 : index
    %c0_9 = arith.constant 0 : index
    %21 = vector.load %arg4[%c2, %c0_9] : memref<3x16xf32, #tpu.memory_space<vmem>>, vector<1x16xf32>
    %22 = vector.broadcast %20 : vector<4x1xf32> to vector<4x16xf32>
    %23 = vector.broadcast %21 : vector<1x16xf32> to vector<4x16xf32>
    %24 = arith.mulf %22, %23 : vector<4x16xf32>
    %25 = arith.addf %19, %24 : vector<4x16xf32>
    %cst_10 = arith.constant 0.000000e+00 : f32
    %26 = vector.broadcast %cst_10 : f32 to vector<4x16xf32>
    %27 = arith.subf %26, %25 : vector<4x16xf32>
    %28 = math.exp %27 : vector<4x16xf32>
    %cst_11 = arith.constant 1.000000e+00 : f32
    %29 = vector.broadcast %cst_11 : f32 to vector<4x16xf32>
    %30 = arith.addf %29, %28 : vector<4x16xf32>
    %cst_12 = arith.constant 1.000000e+00 : f32
    %31 = vector.broadcast %cst_12 : f32 to vector<4x16xf32>
    %32 = arith.divf %31, %30 : vector<4x16xf32>
    %33 = vector.shape_cast %32 : vector<4x16xf32> to vector<2x2x1x1x16xf32>
    %c0_13 = arith.constant 0 : index
    %c0_14 = arith.constant 0 : index
    %c0_15 = arith.constant 0 : index
    %34 = vector.load %arg2[%c0_13, %c0_14, %c0_15] : memref<2x8x128xf32, #tpu.memory_space<vmem>>, vector<2x8x128xf32>
    %cst_16 = arith.constant 0.000000e+00 : f32
    %35 = vector.broadcast %cst_16 : f32 to vector<2x2x8x128xf32>
    %c0_17 = arith.constant 0 : index
    %36 = memref.load %arg6[%c0_17] : memref<16xf32, #tpu.memory_space<smem>>
    %37 = vector.broadcast %36 : f32 to vector<2x8x128xf32>
    %38 = arith.mulf %37, %34 : vector<2x8x128xf32>
    %c0_18 = arith.constant 0 : index
    %39 = memref.load %arg7[%c0_18] : memref<16xf32, #tpu.memory_space<smem>>
    %40 = vector.broadcast %39 : f32 to vector<2x8x128xf32>
    %41 = arith.addf %38, %40 : vector<2x8x128xf32>
    %cst_19 = arith.constant 0.000000e+00 : f32
    %42 = vector.broadcast %cst_19 : f32 to vector<2x8x128xf32>
    %43 = arith.maximumf %41, %42 : vector<2x8x128xf32>
    %44 = vector.extract_strided_slice %33 {offsets = [0, 0, 0, 0, 0], sizes = [2, 2, 1, 1, 1], strides = [1, 1, 1, 1, 1]} : vector<2x2x1x1x16xf32> to vector<2x2x1x1x1xf32>
    %45 = vector.shape_cast %44 : vector<2x2x1x1x1xf32> to vector<2x2x1x1xf32>
    %46 = vector.shape_cast %43 : vector<2x8x128xf32> to vector<1x2x8x128xf32>
    %47 = vector.broadcast %45 : vector<2x2x1x1xf32> to vector<2x2x8x128xf32>
    %48 = vector.broadcast %46 : vector<1x2x8x128xf32> to vector<2x2x8x128xf32>
    %49 = arith.mulf %47, %48 : vector<2x2x8x128xf32>
    %50 = arith.addf %35, %49 : vector<2x2x8x128xf32>
    %c1_20 = arith.constant 1 : index
    %51 = memref.load %arg6[%c1_20] : memref<16xf32, #tpu.memory_space<smem>>
    %52 = vector.broadcast %51 : f32 to vector<2x8x128xf32>
    %53 = arith.mulf %52, %34 : vector<2x8x128xf32>
    %c1_21 = arith.constant 1 : index
    %54 = memref.load %arg7[%c1_21] : memref<16xf32, #tpu.memory_space<smem>>
    %55 = vector.broadcast %54 : f32 to vector<2x8x128xf32>
    %56 = arith.addf %53, %55 : vector<2x8x128xf32>
    %cst_22 = arith.constant 0.000000e+00 : f32
    %57 = vector.broadcast %cst_22 : f32 to vector<2x8x128xf32>
    %58 = arith.maximumf %56, %57 : vector<2x8x128xf32>
    %59 = vector.extract_strided_slice %33 {offsets = [0, 0, 0, 0, 1], sizes = [2, 2, 1, 1, 1], strides = [1, 1, 1, 1, 1]} : vector<2x2x1x1x16xf32> to vector<2x2x1x1x1xf32>
    %60 = vector.shape_cast %59 : vector<2x2x1x1x1xf32> to vector<2x2x1x1xf32>
    %61 = vector.shape_cast %58 : vector<2x8x128xf32> to vector<1x2x8x128xf32>
    %62 = vector.broadcast %60 : vector<2x2x1x1xf32> to vector<2x2x8x128xf32>
    %63 = vector.broadcast %61 : vector<1x2x8x128xf32> to vector<2x2x8x128xf32>
    %64 = arith.mulf %62, %63 : vector<2x2x8x128xf32>
    %65 = arith.addf %50, %64 : vector<2x2x8x128xf32>
    %c2_23 = arith.constant 2 : index
    %66 = memref.load %arg6[%c2_23] : memref<16xf32, #tpu.memory_space<smem>>
    %67 = vector.broadcast %66 : f32 to vector<2x8x128xf32>
    %68 = arith.mulf %67, %34 : vector<2x8x128xf32>
    %c2_24 = arith.constant 2 : index
    %69 = memref.load %arg7[%c2_24] : memref<16xf32, #tpu.memory_space<smem>>
    %70 = vector.broadcast %69 : f32 to vector<2x8x128xf32>
    %71 = arith.addf %68, %70 : vector<2x8x128xf32>
    %cst_25 = arith.constant 0.000000e+00 : f32
    %72 = vector.broadcast %cst_25 : f32 to vector<2x8x128xf32>
    %73 = arith.maximumf %71, %72 : vector<2x8x128xf32>
    %74 = vector.extract_strided_slice %33 {offsets = [0, 0, 0, 0, 2], sizes = [2, 2, 1, 1, 1], strides = [1, 1, 1, 1, 1]} : vector<2x2x1x1x16xf32> to vector<2x2x1x1x1xf32>
    %75 = vector.shape_cast %74 : vector<2x2x1x1x1xf32> to vector<2x2x1x1xf32>
    %76 = vector.shape_cast %73 : vector<2x8x128xf32> to vector<1x2x8x128xf32>
    %77 = vector.broadcast %75 : vector<2x2x1x1xf32> to vector<2x2x8x128xf32>
    %78 = vector.broadcast %76 : vector<1x2x8x128xf32> to vector<2x2x8x128xf32>
    %79 = arith.mulf %77, %78 : vector<2x2x8x128xf32>
    %80 = arith.addf %65, %79 : vector<2x2x8x128xf32>
    %c3 = arith.constant 3 : index
    %81 = memref.load %arg6[%c3] : memref<16xf32, #tpu.memory_space<smem>>
    %82 = vector.broadcast %81 : f32 to vector<2x8x128xf32>
    %83 = arith.mulf %82, %34 : vector<2x8x128xf32>
    %c3_26 = arith.constant 3 : index
    %84 = memref.load %arg7[%c3_26] : memref<16xf32, #tpu.memory_space<smem>>
    %85 = vector.broadcast %84 : f32 to vector<2x8x128xf32>
    %86 = arith.addf %83, %85 : vector<2x8x128xf32>
    %cst_27 = arith.constant 0.000000e+00 : f32
    %87 = vector.broadcast %cst_27 : f32 to vector<2x8x128xf32>
    %88 = arith.maximumf %86, %87 : vector<2x8x128xf32>
    %89 = vector.extract_strided_slice %33 {offsets = [0, 0, 0, 0, 3], sizes = [2, 2, 1, 1, 1], strides = [1, 1, 1, 1, 1]} : vector<2x2x1x1x16xf32> to vector<2x2x1x1x1xf32>
    %90 = vector.shape_cast %89 : vector<2x2x1x1x1xf32> to vector<2x2x1x1xf32>
    %91 = vector.shape_cast %88 : vector<2x8x128xf32> to vector<1x2x8x128xf32>
    %92 = vector.broadcast %90 : vector<2x2x1x1xf32> to vector<2x2x8x128xf32>
    %93 = vector.broadcast %91 : vector<1x2x8x128xf32> to vector<2x2x8x128xf32>
    %94 = arith.mulf %92, %93 : vector<2x2x8x128xf32>
    %95 = arith.addf %80, %94 : vector<2x2x8x128xf32>
    %c4 = arith.constant 4 : index
    %96 = memref.load %arg6[%c4] : memref<16xf32, #tpu.memory_space<smem>>
    %97 = vector.broadcast %96 : f32 to vector<2x8x128xf32>
    %98 = arith.mulf %97, %34 : vector<2x8x128xf32>
    %c4_28 = arith.constant 4 : index
    %99 = memref.load %arg7[%c4_28] : memref<16xf32, #tpu.memory_space<smem>>
    %100 = vector.broadcast %99 : f32 to vector<2x8x128xf32>
    %101 = arith.addf %98, %100 : vector<2x8x128xf32>
    %cst_29 = arith.constant 0.000000e+00 : f32
    %102 = vector.broadcast %cst_29 : f32 to vector<2x8x128xf32>
    %103 = arith.maximumf %101, %102 : vector<2x8x128xf32>
    %104 = vector.extract_strided_slice %33 {offsets = [0, 0, 0, 0, 4], sizes = [2, 2, 1, 1, 1], strides = [1, 1, 1, 1, 1]} : vector<2x2x1x1x16xf32> to vector<2x2x1x1x1xf32>
    %105 = vector.shape_cast %104 : vector<2x2x1x1x1xf32> to vector<2x2x1x1xf32>
    %106 = vector.shape_cast %103 : vector<2x8x128xf32> to vector<1x2x8x128xf32>
    %107 = vector.broadcast %105 : vector<2x2x1x1xf32> to vector<2x2x8x128xf32>
    %108 = vector.broadcast %106 : vector<1x2x8x128xf32> to vector<2x2x8x128xf32>
    %109 = arith.mulf %107, %108 : vector<2x2x8x128xf32>
    %110 = arith.addf %95, %109 : vector<2x2x8x128xf32>
    %c5 = arith.constant 5 : index
    %111 = memref.load %arg6[%c5] : memref<16xf32, #tpu.memory_space<smem>>
    %112 = vector.broadcast %111 : f32 to vector<2x8x128xf32>
    %113 = arith.mulf %112, %34 : vector<2x8x128xf32>
    %c5_30 = arith.constant 5 : index
    %114 = memref.load %arg7[%c5_30] : memref<16xf32, #tpu.memory_space<smem>>
    %115 = vector.broadcast %114 : f32 to vector<2x8x128xf32>
    %116 = arith.addf %113, %115 : vector<2x8x128xf32>
    %cst_31 = arith.constant 0.000000e+00 : f32
    %117 = vector.broadcast %cst_31 : f32 to vector<2x8x128xf32>
    %118 = arith.maximumf %116, %117 : vector<2x8x128xf32>
    %119 = vector.extract_strided_slice %33 {offsets = [0, 0, 0, 0, 5], sizes = [2, 2, 1, 1, 1], strides = [1, 1, 1, 1, 1]} : vector<2x2x1x1x16xf32> to vector<2x2x1x1x1xf32>
    %120 = vector.shape_cast %119 : vector<2x2x1x1x1xf32> to vector<2x2x1x1xf32>
    %121 = vector.shape_cast %118 : vector<2x8x128xf32> to vector<1x2x8x128xf32>
    %122 = vector.broadcast %120 : vector<2x2x1x1xf32> to vector<2x2x8x128xf32>
    %123 = vector.broadcast %121 : vector<1x2x8x128xf32> to vector<2x2x8x128xf32>
    %124 = arith.mulf %122, %123 : vector<2x2x8x128xf32>
    %125 = arith.addf %110, %124 : vector<2x2x8x128xf32>
    %c6 = arith.constant 6 : index
    %126 = memref.load %arg6[%c6] : memref<16xf32, #tpu.memory_space<smem>>
    %127 = vector.broadcast %126 : f32 to vector<2x8x128xf32>
    %128 = arith.mulf %127, %34 : vector<2x8x128xf32>
    %c6_32 = arith.constant 6 : index
    %129 = memref.load %arg7[%c6_32] : memref<16xf32, #tpu.memory_space<smem>>
    %130 = vector.broadcast %129 : f32 to vector<2x8x128xf32>
    %131 = arith.addf %128, %130 : vector<2x8x128xf32>
    %cst_33 = arith.constant 0.000000e+00 : f32
    %132 = vector.broadcast %cst_33 : f32 to vector<2x8x128xf32>
    %133 = arith.maximumf %131, %132 : vector<2x8x128xf32>
    %134 = vector.extract_strided_slice %33 {offsets = [0, 0, 0, 0, 6], sizes = [2, 2, 1, 1, 1], strides = [1, 1, 1, 1, 1]} : vector<2x2x1x1x16xf32> to vector<2x2x1x1x1xf32>
    %135 = vector.shape_cast %134 : vector<2x2x1x1x1xf32> to vector<2x2x1x1xf32>
    %136 = vector.shape_cast %133 : vector<2x8x128xf32> to vector<1x2x8x128xf32>
    %137 = vector.broadcast %135 : vector<2x2x1x1xf32> to vector<2x2x8x128xf32>
    %138 = vector.broadcast %136 : vector<1x2x8x128xf32> to vector<2x2x8x128xf32>
    %139 = arith.mulf %137, %138 : vector<2x2x8x128xf32>
    %140 = arith.addf %125, %139 : vector<2x2x8x128xf32>
    %c7 = arith.constant 7 : index
    %141 = memref.load %arg6[%c7] : memref<16xf32, #tpu.memory_space<smem>>
    %142 = vector.broadcast %141 : f32 to vector<2x8x128xf32>
    %143 = arith.mulf %142, %34 : vector<2x8x128xf32>
    %c7_34 = arith.constant 7 : index
    %144 = memref.load %arg7[%c7_34] : memref<16xf32, #tpu.memory_space<smem>>
    %145 = vector.broadcast %144 : f32 to vector<2x8x128xf32>
    %146 = arith.addf %143, %145 : vector<2x8x128xf32>
    %cst_35 = arith.constant 0.000000e+00 : f32
    %147 = vector.broadcast %cst_35 : f32 to vector<2x8x128xf32>
    %148 = arith.maximumf %146, %147 : vector<2x8x128xf32>
    %149 = vector.extract_strided_slice %33 {offsets = [0, 0, 0, 0, 7], sizes = [2, 2, 1, 1, 1], strides = [1, 1, 1, 1, 1]} : vector<2x2x1x1x16xf32> to vector<2x2x1x1x1xf32>
    %150 = vector.shape_cast %149 : vector<2x2x1x1x1xf32> to vector<2x2x1x1xf32>
    %151 = vector.shape_cast %148 : vector<2x8x128xf32> to vector<1x2x8x128xf32>
    %152 = vector.broadcast %150 : vector<2x2x1x1xf32> to vector<2x2x8x128xf32>
    %153 = vector.broadcast %151 : vector<1x2x8x128xf32> to vector<2x2x8x128xf32>
    %154 = arith.mulf %152, %153 : vector<2x2x8x128xf32>
    %155 = arith.addf %140, %154 : vector<2x2x8x128xf32>
    %c8 = arith.constant 8 : index
    %156 = memref.load %arg6[%c8] : memref<16xf32, #tpu.memory_space<smem>>
    %157 = vector.broadcast %156 : f32 to vector<2x8x128xf32>
    %158 = arith.mulf %157, %34 : vector<2x8x128xf32>
    %c8_36 = arith.constant 8 : index
    %159 = memref.load %arg7[%c8_36] : memref<16xf32, #tpu.memory_space<smem>>
    %160 = vector.broadcast %159 : f32 to vector<2x8x128xf32>
    %161 = arith.addf %158, %160 : vector<2x8x128xf32>
    %cst_37 = arith.constant 0.000000e+00 : f32
    %162 = vector.broadcast %cst_37 : f32 to vector<2x8x128xf32>
    %163 = arith.maximumf %161, %162 : vector<2x8x128xf32>
    %164 = vector.extract_strided_slice %33 {offsets = [0, 0, 0, 0, 8], sizes = [2, 2, 1, 1, 1], strides = [1, 1, 1, 1, 1]} : vector<2x2x1x1x16xf32> to vector<2x2x1x1x1xf32>
    %165 = vector.shape_cast %164 : vector<2x2x1x1x1xf32> to vector<2x2x1x1xf32>
    %166 = vector.shape_cast %163 : vector<2x8x128xf32> to vector<1x2x8x128xf32>
    %167 = vector.broadcast %165 : vector<2x2x1x1xf32> to vector<2x2x8x128xf32>
    %168 = vector.broadcast %166 : vector<1x2x8x128xf32> to vector<2x2x8x128xf32>
    %169 = arith.mulf %167, %168 : vector<2x2x8x128xf32>
    %170 = arith.addf %155, %169 : vector<2x2x8x128xf32>
    %c9 = arith.constant 9 : index
    %171 = memref.load %arg6[%c9] : memref<16xf32, #tpu.memory_space<smem>>
    %172 = vector.broadcast %171 : f32 to vector<2x8x128xf32>
    %173 = arith.mulf %172, %34 : vector<2x8x128xf32>
    %c9_38 = arith.constant 9 : index
    %174 = memref.load %arg7[%c9_38] : memref<16xf32, #tpu.memory_space<smem>>
    %175 = vector.broadcast %174 : f32 to vector<2x8x128xf32>
    %176 = arith.addf %173, %175 : vector<2x8x128xf32>
    %cst_39 = arith.constant 0.000000e+00 : f32
    %177 = vector.broadcast %cst_39 : f32 to vector<2x8x128xf32>
    %178 = arith.maximumf %176, %177 : vector<2x8x128xf32>
    %179 = vector.extract_strided_slice %33 {offsets = [0, 0, 0, 0, 9], sizes = [2, 2, 1, 1, 1], strides = [1, 1, 1, 1, 1]} : vector<2x2x1x1x16xf32> to vector<2x2x1x1x1xf32>
    %180 = vector.shape_cast %179 : vector<2x2x1x1x1xf32> to vector<2x2x1x1xf32>
    %181 = vector.shape_cast %178 : vector<2x8x128xf32> to vector<1x2x8x128xf32>
    %182 = vector.broadcast %180 : vector<2x2x1x1xf32> to vector<2x2x8x128xf32>
    %183 = vector.broadcast %181 : vector<1x2x8x128xf32> to vector<2x2x8x128xf32>
    %184 = arith.mulf %182, %183 : vector<2x2x8x128xf32>
    %185 = arith.addf %170, %184 : vector<2x2x8x128xf32>
    %c10 = arith.constant 10 : index
    %186 = memref.load %arg6[%c10] : memref<16xf32, #tpu.memory_space<smem>>
    %187 = vector.broadcast %186 : f32 to vector<2x8x128xf32>
    %188 = arith.mulf %187, %34 : vector<2x8x128xf32>
    %c10_40 = arith.constant 10 : index
    %189 = memref.load %arg7[%c10_40] : memref<16xf32, #tpu.memory_space<smem>>
    %190 = vector.broadcast %189 : f32 to vector<2x8x128xf32>
    %191 = arith.addf %188, %190 : vector<2x8x128xf32>
    %cst_41 = arith.constant 0.000000e+00 : f32
    %192 = vector.broadcast %cst_41 : f32 to vector<2x8x128xf32>
    %193 = arith.maximumf %191, %192 : vector<2x8x128xf32>
    %194 = vector.extract_strided_slice %33 {offsets = [0, 0, 0, 0, 10], sizes = [2, 2, 1, 1, 1], strides = [1, 1, 1, 1, 1]} : vector<2x2x1x1x16xf32> to vector<2x2x1x1x1xf32>
    %195 = vector.shape_cast %194 : vector<2x2x1x1x1xf32> to vector<2x2x1x1xf32>
    %196 = vector.shape_cast %193 : vector<2x8x128xf32> to vector<1x2x8x128xf32>
    %197 = vector.broadcast %195 : vector<2x2x1x1xf32> to vector<2x2x8x128xf32>
    %198 = vector.broadcast %196 : vector<1x2x8x128xf32> to vector<2x2x8x128xf32>
    %199 = arith.mulf %197, %198 : vector<2x2x8x128xf32>
    %200 = arith.addf %185, %199 : vector<2x2x8x128xf32>
    %c11 = arith.constant 11 : index
    %201 = memref.load %arg6[%c11] : memref<16xf32, #tpu.memory_space<smem>>
    %202 = vector.broadcast %201 : f32 to vector<2x8x128xf32>
    %203 = arith.mulf %202, %34 : vector<2x8x128xf32>
    %c11_42 = arith.constant 11 : index
    %204 = memref.load %arg7[%c11_42] : memref<16xf32, #tpu.memory_space<smem>>
    %205 = vector.broadcast %204 : f32 to vector<2x8x128xf32>
    %206 = arith.addf %203, %205 : vector<2x8x128xf32>
    %cst_43 = arith.constant 0.000000e+00 : f32
    %207 = vector.broadcast %cst_43 : f32 to vector<2x8x128xf32>
    %208 = arith.maximumf %206, %207 : vector<2x8x128xf32>
    %209 = vector.extract_strided_slice %33 {offsets = [0, 0, 0, 0, 11], sizes = [2, 2, 1, 1, 1], strides = [1, 1, 1, 1, 1]} : vector<2x2x1x1x16xf32> to vector<2x2x1x1x1xf32>
    %210 = vector.shape_cast %209 : vector<2x2x1x1x1xf32> to vector<2x2x1x1xf32>
    %211 = vector.shape_cast %208 : vector<2x8x128xf32> to vector<1x2x8x128xf32>
    %212 = vector.broadcast %210 : vector<2x2x1x1xf32> to vector<2x2x8x128xf32>
    %213 = vector.broadcast %211 : vector<1x2x8x128xf32> to vector<2x2x8x128xf32>
    %214 = arith.mulf %212, %213 : vector<2x2x8x128xf32>
    %215 = arith.addf %200, %214 : vector<2x2x8x128xf32>
    %c12 = arith.constant 12 : index
    %216 = memref.load %arg6[%c12] : memref<16xf32, #tpu.memory_space<smem>>
    %217 = vector.broadcast %216 : f32 to vector<2x8x128xf32>
    %218 = arith.mulf %217, %34 : vector<2x8x128xf32>
    %c12_44 = arith.constant 12 : index
    %219 = memref.load %arg7[%c12_44] : memref<16xf32, #tpu.memory_space<smem>>
    %220 = vector.broadcast %219 : f32 to vector<2x8x128xf32>
    %221 = arith.addf %218, %220 : vector<2x8x128xf32>
    %cst_45 = arith.constant 0.000000e+00 : f32
    %222 = vector.broadcast %cst_45 : f32 to vector<2x8x128xf32>
    %223 = arith.maximumf %221, %222 : vector<2x8x128xf32>
    %224 = vector.extract_strided_slice %33 {offsets = [0, 0, 0, 0, 12], sizes = [2, 2, 1, 1, 1], strides = [1, 1, 1, 1, 1]} : vector<2x2x1x1x16xf32> to vector<2x2x1x1x1xf32>
    %225 = vector.shape_cast %224 : vector<2x2x1x1x1xf32> to vector<2x2x1x1xf32>
    %226 = vector.shape_cast %223 : vector<2x8x128xf32> to vector<1x2x8x128xf32>
    %227 = vector.broadcast %225 : vector<2x2x1x1xf32> to vector<2x2x8x128xf32>
    %228 = vector.broadcast %226 : vector<1x2x8x128xf32> to vector<2x2x8x128xf32>
    %229 = arith.mulf %227, %228 : vector<2x2x8x128xf32>
    %230 = arith.addf %215, %229 : vector<2x2x8x128xf32>
    %c13 = arith.constant 13 : index
    %231 = memref.load %arg6[%c13] : memref<16xf32, #tpu.memory_space<smem>>
    %232 = vector.broadcast %231 : f32 to vector<2x8x128xf32>
    %233 = arith.mulf %232, %34 : vector<2x8x128xf32>
    %c13_46 = arith.constant 13 : index
    %234 = memref.load %arg7[%c13_46] : memref<16xf32, #tpu.memory_space<smem>>
    %235 = vector.broadcast %234 : f32 to vector<2x8x128xf32>
    %236 = arith.addf %233, %235 : vector<2x8x128xf32>
    %cst_47 = arith.constant 0.000000e+00 : f32
    %237 = vector.broadcast %cst_47 : f32 to vector<2x8x128xf32>
    %238 = arith.maximumf %236, %237 : vector<2x8x128xf32>
    %239 = vector.extract_strided_slice %33 {offsets = [0, 0, 0, 0, 13], sizes = [2, 2, 1, 1, 1], strides = [1, 1, 1, 1, 1]} : vector<2x2x1x1x16xf32> to vector<2x2x1x1x1xf32>
    %240 = vector.shape_cast %239 : vector<2x2x1x1x1xf32> to vector<2x2x1x1xf32>
    %241 = vector.shape_cast %238 : vector<2x8x128xf32> to vector<1x2x8x128xf32>
    %242 = vector.broadcast %240 : vector<2x2x1x1xf32> to vector<2x2x8x128xf32>
    %243 = vector.broadcast %241 : vector<1x2x8x128xf32> to vector<2x2x8x128xf32>
    %244 = arith.mulf %242, %243 : vector<2x2x8x128xf32>
    %245 = arith.addf %230, %244 : vector<2x2x8x128xf32>
    %c14 = arith.constant 14 : index
    %246 = memref.load %arg6[%c14] : memref<16xf32, #tpu.memory_space<smem>>
    %247 = vector.broadcast %246 : f32 to vector<2x8x128xf32>
    %248 = arith.mulf %247, %34 : vector<2x8x128xf32>
    %c14_48 = arith.constant 14 : index
    %249 = memref.load %arg7[%c14_48] : memref<16xf32, #tpu.memory_space<smem>>
    %250 = vector.broadcast %249 : f32 to vector<2x8x128xf32>
    %251 = arith.addf %248, %250 : vector<2x8x128xf32>
    %cst_49 = arith.constant 0.000000e+00 : f32
    %252 = vector.broadcast %cst_49 : f32 to vector<2x8x128xf32>
    %253 = arith.maximumf %251, %252 : vector<2x8x128xf32>
    %254 = vector.extract_strided_slice %33 {offsets = [0, 0, 0, 0, 14], sizes = [2, 2, 1, 1, 1], strides = [1, 1, 1, 1, 1]} : vector<2x2x1x1x16xf32> to vector<2x2x1x1x1xf32>
    %255 = vector.shape_cast %254 : vector<2x2x1x1x1xf32> to vector<2x2x1x1xf32>
    %256 = vector.shape_cast %253 : vector<2x8x128xf32> to vector<1x2x8x128xf32>
    %257 = vector.broadcast %255 : vector<2x2x1x1xf32> to vector<2x2x8x128xf32>
    %258 = vector.broadcast %256 : vector<1x2x8x128xf32> to vector<2x2x8x128xf32>
    %259 = arith.mulf %257, %258 : vector<2x2x8x128xf32>
    %260 = arith.addf %245, %259 : vector<2x2x8x128xf32>
    %c15 = arith.constant 15 : index
    %261 = memref.load %arg6[%c15] : memref<16xf32, #tpu.memory_space<smem>>
    %262 = vector.broadcast %261 : f32 to vector<2x8x128xf32>
    %263 = arith.mulf %262, %34 : vector<2x8x128xf32>
    %c15_50 = arith.constant 15 : index
    %264 = memref.load %arg7[%c15_50] : memref<16xf32, #tpu.memory_space<smem>>
    %265 = vector.broadcast %264 : f32 to vector<2x8x128xf32>
    %266 = arith.addf %263, %265 : vector<2x8x128xf32>
    %cst_51 = arith.constant 0.000000e+00 : f32
    %267 = vector.broadcast %cst_51 : f32 to vector<2x8x128xf32>
    %268 = arith.maximumf %266, %267 : vector<2x8x128xf32>
    %269 = vector.extract_strided_slice %33 {offsets = [0, 0, 0, 0, 15], sizes = [2, 2, 1, 1, 1], strides = [1, 1, 1, 1, 1]} : vector<2x2x1x1x16xf32> to vector<2x2x1x1x1xf32>
    %270 = vector.shape_cast %269 : vector<2x2x1x1x1xf32> to vector<2x2x1x1xf32>
    %271 = vector.shape_cast %268 : vector<2x8x128xf32> to vector<1x2x8x128xf32>
    %272 = vector.broadcast %270 : vector<2x2x1x1xf32> to vector<2x2x8x128xf32>
    %273 = vector.broadcast %271 : vector<1x2x8x128xf32> to vector<2x2x8x128xf32>
    %274 = arith.mulf %272, %273 : vector<2x2x8x128xf32>
    %275 = arith.addf %260, %274 : vector<2x2x8x128xf32>
    %276 = vector.shape_cast %275 : vector<2x2x8x128xf32> to vector<4x8x128xf32>
    %c0_52 = arith.constant 0 : index
    %c0_53 = arith.constant 0 : index
    %c0_54 = arith.constant 0 : index
    %277 = vector.load %arg8[%c0_52, %c0_53, %c0_54] : memref<4x8x128xf32, #tpu.memory_space<vmem>>, vector<4x8x128xf32>
    tpu.vector_store %arg8[%c0_52, %c0_53, %c0_54], %276 {strides = array<i32>} : memref<4x8x128xf32, #tpu.memory_space<vmem>>, vector<4x8x128xf32>,
    %c0_55 = arith.constant 0 : index
    %c0_56 = arith.constant 0 : index
    %c0_57 = arith.constant 0 : index
    %278 = vector.load %arg3[%c0_55, %c0_56, %c0_57] : memref<4x8x128xf32, #tpu.memory_space<vmem>>, vector<4x8x128xf32>
    %279 = arith.subf %276, %278 : vector<4x8x128xf32>
    %280 = math.absf %279 : vector<4x8x128xf32>
    %281 = vector.shape_cast %280 : vector<4x8x128xf32> to vector<1x4x8x128xf32>
    %cst_58 = arith.constant dense<0.000000e+00> : vector<1xf32>
    %282 = vector.multi_reduction <add>, %281, %cst_58 [1, 2, 3] : vector<1x4x8x128xf32> to vector<1xf32>
    %283 = vector.shape_cast %282 : vector<1xf32> to vector<1x1x1x1xf32>
    %284 = vector.extract %283[0, 0, 0, 0] : f32 from vector<1x1x1x1xf32>
    %c0_59 = arith.constant 0 : index
    %c0_60 = arith.constant 0 : index
    %285 = memref.load %arg9[%c0_59, %c0_60] : memref<1x1xf32, #tpu.memory_space<smem>>
    memref.store %284, %arg9[%c0_59, %c0_60] : memref<1x1xf32, #tpu.memory_space<smem>>
    return
  }
  func.func @transform_0(%arg0: i32) -> (i32, i32, i32) {
    %c0_i32 = arith.constant 0 : i32
    %c0_i32_0 = arith.constant 0 : i32
    %c0_i32_1 = arith.constant 0 : i32
    %c0_i32_2 = arith.constant 0 : i32
    return %c0_i32, %c0_i32_0, %c0_i32_1 : i32, i32, i32
  }
  func.func @transform_1(%arg0: i32) -> (i32, i32, i32) {
    %c0_i32 = arith.constant 0 : i32
    %c0_i32_0 = arith.constant 0 : i32
    %c0_i32_1 = arith.constant 0 : i32
    return %c0_i32, %c0_i32_0, %arg0 : i32, i32, i32
  }
  func.func @transform_2(%arg0: i32) -> (i32, i32, i32) {
    %c0_i32 = arith.constant 0 : i32
    %c0_i32_0 = arith.constant 0 : i32
    %c0_i32_1 = arith.constant 0 : i32
    return %c0_i32, %c0_i32_0, %arg0 : i32, i32, i32
  }
  func.func @transform_3(%arg0: i32) -> (i32, i32) {
    %c0_i32 = arith.constant 0 : i32
    %c0_i32_0 = arith.constant 0 : i32
    %c0_i32_1 = arith.constant 0 : i32
    return %c0_i32, %c0_i32_0 : i32, i32
  }
  func.func @transform_4(%arg0: i32) -> (i32, i32) {
    %c0_i32 = arith.constant 0 : i32
    %c0_i32_0 = arith.constant 0 : i32
    %c0_i32_1 = arith.constant 0 : i32
    return %c0_i32, %c0_i32_0 : i32, i32
  }
  func.func @transform_5(%arg0: i32) -> i32 {
    %c0_i32 = arith.constant 0 : i32
    %c0_i32_0 = arith.constant 0 : i32
    return %c0_i32 : i32
  }
  func.func @transform_6(%arg0: i32) -> i32 {
    %c0_i32 = arith.constant 0 : i32
    %c0_i32_0 = arith.constant 0 : i32
    return %c0_i32 : i32
  }
  func.func @transform_7(%arg0: i32) -> (i32, i32, i32) {
    %c0_i32 = arith.constant 0 : i32
    %c0_i32_0 = arith.constant 0 : i32
    %c0_i32_1 = arith.constant 0 : i32
    return %c0_i32, %c0_i32_0, %arg0 : i32, i32, i32
  }
  func.func @transform_8(%arg0: i32) -> (i32, i32) {
    %c0_i32 = arith.constant 0 : i32
    %c0_i32_0 = arith.constant 0 : i32
    return %arg0, %c0_i32 : i32, i32
  }
}

</mosaic_0001>

<bundles_post_ra>
// kernel: net_wrapper_forward.1
= control target key start
LH: loop header
LB: loop body
LE: loop exit
PB: predicated region body
PF: predicated region fallthrough
CT: control target
= control target key end

     0   :  { %14 = vsyncpa [#allocation4], 0  ;;  %s2214_s0 = inlined_call_operand.vmem [shape: f32[4,3,768], index: 0, kind: input, shape index: {}]   ;;  %s2215_s1 = inlined_call_operand.vmem [shape: f32[2,8,128], index: 1, kind: input, shape index: {}]   ;;  %s2216_s2 = inlined_call_operand.vmem [shape: f32[4,8,128], index: 2, kind: input, shape index: {}]   ;;  %s2217_s3 = inlined_call_operand.vmem [shape: f32[3,16], index: 3, kind: input, shape index: {}]   ;;  %s2218_s4 = inlined_call_operand.vmem [shape: f32[1,16], index: 4, kind: input, shape index: {}]   ;;  %s2219_s5 = inlined_call_operand.vmem [shape: f32[16], index: 5, kind: input, shape index: {}]   ;;  %s2220_s6 = inlined_call_operand.vmem [shape: f32[16], index: 6, kind: input, shape index: {}]   ;;  %s2221_s7 = inlined_call_operand.vmem [shape: f32[4,8,128], index: 7, kind: output, shape index: {0}]   ;;  %s2222_s8 = inlined_call_operand.hbm [shape: f32[1,1], index: 8, kind: output, shape index: {1}]  }
   0x1   :  { %15 = vsyncpa [#allocation6], 0 }
   0x2   :  { %16 = vsyncpa [#allocation3], 0  ;;  %s33_s29 = sshll.u32 %s2219_s5, 4  ;;  %s43_s10 = sshll.u32 %s2220_s6, 4  ;;  %s34_s29 = int_to_ptr.vmem [resolvable:$true] %s33_s29  ;;  %s44_s10 = int_to_ptr.vmem [resolvable:$true] %s43_s10 }
   0x3   :  { %s1286_s11 = scalar_lea.vmem %s34_s29, 16  ;;  %p1291_p1 = scmp.lt.s32.totalorder %s34_s29, %s34_s29 }
   0x4   :  { %p1287_p0 = scmp.ne.s32.totalorder %s34_s29, %s1286_s11  ;;  %p1292_p2 = scmp.lt.s32.totalorder %s1286_s11, %s1286_s11 }
   0x6   :  { %p1293_p3 = por %p1292_p2, %p1291_p1 }
   0x8   :  { %p1294_p4 = pnand %p1293_p3, %p1287_p0 }
   0xa   :  { %1297 = shalt.err (!%p1294_p4)
}
   0xb   :  { %s1324_s12 = smov [#allocation2]   ;;  %s1298_s13 = scalar_lea.vmem %s44_s10, 16 }
   0xc   :  { %36 = dma.vmem_to_smem %s34_s29, 16, %s1324_s12, [#allocation4]  }
   0xd   :  { %p1299_p5 = scmp.ne.s32.totalorder %s44_s10, %s1298_s13  ;;  %p1303_p6 = scmp.lt.s32.totalorder %s44_s10, %s44_s10 }
   0xe   :  { %p1304_p7 = scmp.lt.s32.totalorder %s1298_s13, %s1298_s13 }
  0x10   :  { %p1305_p8 = por %p1304_p7, %p1303_p6 }
  0x12   :  { %p1306_p9 = pnand %p1305_p8, %p1299_p5 }
  0x14   :  { %1309 = shalt.err (!%p1306_p9)
}
  0x15   :  { %s1325_s5 = smov [#allocation5]  }
  0x16   :  { %46 = dma.vmem_to_smem %s44_s10, 16, %s1325_s5, [#allocation6]  }
  0x17   :  { %1318 = dma.done.wait [#allocation4], 16  }
  0x18   :  { %1319 = vsyncadd [#allocation4], 4294967280 }
  0x19   :  { %1320 = dma.done.wait [#allocation6], 16  }
  0x1a   :  { %1321 = vsyncadd [#allocation6], 4294967280 }
  0x1b   :  { %53 = sfence }
  0x1c   :  { %v60_v0 = vld [vmem:[%s2214_s0 + $0x30] sm:$0x77]  ;;  %v61_v1 = vld [vmem:[%s2214_s0 + $0x38] sm:$0x77]  ;;  %v62_v2 = vld [vmem:[%s2214_s0 + $0x40] sm:$0x77] }
  0x1d   :  { %v84_v3 = vcombine.high %v60_v0, %v60_v0  ;;  %v85_v4 = vcombine.high %v61_v1, %v61_v1  ;;  %vm102_vm0 = vcmask 1042432   ;;  %v54_v5 = vld [vmem:[%s2214_s0] sm:$0x77]  ;;  %v55_v6 = vld [vmem:[%s2214_s0 + $0x8] sm:$0x77]  ;;  %v86_v10 = vcombine.high %v62_v2, %v62_v2  ;;  %s1676_s19 = sld [smem:[#allocation2]] }
  0x1e   :  { %v129_v7 = vsel %vm102_vm0, %v60_v0, 0.0  ;;  %v56_v8 = vld [vmem:[%s2214_s0 + $0x10] sm:$0x77]  ;;  %v78_v9 = vcombine.high %v54_v5, %v54_v5  ;;  %v132_v12 = vsel %vm102_vm0, %v61_v1, 0.0  ;;  %v79_v13 = vcombine.high %v55_v6, %v55_v6  ;;  %v63_v14 = vld [vmem:[%s2214_s0 + $0x48] sm:$0x77] }
  0x1f   :  { %v130_v11 = vsel %vm102_vm0, %v84_v3, 0.0  ;;  %v80_v16 = vcombine.high %v56_v8, %v56_v8  ;;  %v103_v17 = vsel %vm102_vm0, %v54_v5, 0.0  ;;  %v64_v19 = vld [vmem:[%s2214_s0 + $0x50] sm:$0x77]  ;;  %v134_v20 = vsel %vm102_vm0, %v85_v4, 0.0  ;;  %s1678_s20 = sld [smem:[#allocation5 + $0x1]] }
  0x20   :  { %v131_v15 = vadd.f32 %v130_v11, %v129_v7  ;;  %v104_v18 = vsel %vm102_vm0, %v78_v9, 0.0  ;;  %v136_v21 = vsel %vm102_vm0, %v62_v2, 0.0  ;;  %v106_v23 = vsel %vm102_vm0, %v55_v6, 0.0  ;;  %v65_v26 = vld [vmem:[%s2214_s0 + $0x58] sm:$0x77]  ;;  %s1681_s21 = sld [smem:[#allocation2 + $0x2]] }
  0x21   :  { %v105_v22 = vadd.f32 %v104_v18, %v103_v17  ;;  %v108_v25 = vsel %vm102_vm0, %v79_v13, 0.0  ;;  %v87_v27 = vcombine.high %v63_v14, %v63_v14  ;;  %v88_v28 = vcombine.high %v64_v19, %v64_v19  ;;  %v57_v29 = vld [vmem:[%s2214_s0 + $0x18] sm:$0x77]  ;;  %v58_v34 = vld [vmem:[%s2214_s0 + $0x20] sm:$0x77]  ;;  %s1688_s22 = sld [smem:[#allocation5]] }
  0x22   :  { %v133_v24 = vadd.f32 %v132_v12, %v131_v15  ;;  %v138_v30 = vsel %vm102_vm0, %v86_v10, 0.0  ;;  %v110_v32 = vsel %vm102_vm0, %v56_v8, 0.0  ;;  %v142_v33 = vsel %vm102_vm0, %v63_v14, 0.0  ;;  %v59_v45 = vld [vmem:[%s2214_s0 + $0x28] sm:$0x77]  ;;  %s1691_s23 = sld [smem:[#allocation2 + $0x3]] }
  0x23   :  { %v107_v31 = vadd.f32 %v106_v23, %v105_v22  ;;  %v112_v36 = vsel %vm102_vm0, %v80_v16, 0.0  ;;  %v143_v37 = vsel %vm102_vm0, %v87_v27, 0.0  ;;  %v145_v38 = vsel %vm102_vm0, %v64_v19, 0.0  ;;  %v1153_v4 = vld [vmem:[%s2217_s3] ss:$0 sm:$0xff]  ;;  %s1699_s26 = sld [smem:[#allocation5 + $0x2]] }
  0x24   :  { %v135_v35 = vadd.f32 %v134_v20, %v133_v24  ;;  %v89_v40 = vcombine.high %v65_v26, %v65_v26  ;;  %v144_v41 = vadd.f32 %v143_v37, %v142_v33  ;;  %v81_v42 = vcombine.high %v57_v29, %v57_v29  ;;  %v1154_v6 = vld [vmem:[%s2217_s3 + $0x1] ss:$0 sm:$0xff]  ;;  %v1155_v7 = vld [vmem:[%s2217_s3 + $0x2] ss:$0 sm:$0xff]  ;;  %s1711_s27 = sld [smem:[#allocation2 + $0x4]] }
  0x25   :  { %v109_v39 = vadd.f32 %v108_v25, %v107_v31  ;;  %v147_v44 = vsel %vm102_vm0, %v88_v28, 0.0  ;;  %v82_v46 = vcombine.high %v58_v34, %v58_v34  ;;  %v116_v47 = vsel %vm102_vm0, %v57_v29, 0.0  ;;  %s1716_s28 = sld [smem:[#allocation5 + $0x3]] }
  0x26   :  { %v137_v43 = vadd.f32 %v136_v21, %v135_v35  ;;  %v146_v49 = vadd.f32 %v145_v38, %v144_v41  ;;  %v117_v50 = vsel %vm102_vm0, %v81_v42, 0.0  ;;  %v119_v51 = vsel %vm102_vm0, %v58_v34, 0.0  ;;  %s1727_s29 = sld [smem:[#allocation2 + $0x5]] }
  0x27   :  { %v111_v48 = vadd.f32 %v110_v32, %v109_v39  ;;  %v149_v53 = vsel %vm102_vm0, %v65_v26, 0.0  ;;  %v118_v54 = vadd.f32 %v117_v50, %v116_v47  ;;  %v83_v57 = vcombine.high %v59_v45, %v59_v45  ;;  %s1732_s30 = sld [smem:[#allocation5 + $0x4]] }
  0x28   :  { %v139_v52 = vadd.f32 %v138_v30, %v137_v43  ;;  %v148_v56 = vadd.f32 %v147_v44, %v146_v49  ;;  %v121_v58 = vsel %vm102_vm0, %v82_v46, 0.0  ;;  %v151_v59 = vsel %vm102_vm0, %v89_v40, 0.0  ;;  %s1742_s9 = sld [smem:[#allocation2 + $0x7]] }
  0x29   :  { %v113_v55 = vadd.f32 %v112_v36, %v111_v48  ;;  %v120_v60 = vadd.f32 %v119_v51, %v118_v54  ;;  %v123_v62 = vsel %vm102_vm0, %v59_v45, 0.0  ;;  %v125_v1 = vsel %vm102_vm0, %v83_v57, 0.0  ;;  %s1745_s10 = sld [smem:[#allocation2 + $0x6]] }
  0x2a   :  { %140 = vadd.xlane.f32.xlu1 %v139_v52  ;;  %v150_v61 = vadd.f32 %v149_v53, %v148_v56  ;;  %v1326_v5 = vmov 0   ;;  %v168_v8 = vlaneseq  ;;  %vm249_vm1 = vcmask 130112   ;;  %s1754_s11 = sld [smem:[#allocation5 + $0x5]] }
  0x2b   :  { %114 = vadd.xlane.f32.xlu0 %v113_v55  ;;  %v122_v63 = vadd.f32 %v121_v58, %v120_v60  ;;  %1209 = vset.pattern.permute.xlu1 %v1326_v5  ;;  %vm278_vm2 = vcmask 1041409   ;;  %vm280_vm3 = vcmask 1042434   ;;  %vm282_vm4 = vcmask 1043459   ;;  %s1766_s12 = sld [smem:[#allocation5 + $0x7]] }
  0x2c   :  { %v152_v0 = vadd.f32 %v151_v59, %v150_v61  ;;  %1208 = vset.pattern.permute.xlu0 %v1326_v5  ;;  %v1467_v10 = vshrl.u32 %v168_v8, 7  ;;  %s1768_s13 = sld [smem:[#allocation5 + $0x6]] }
  0x2d   :  { %v124_v2 = vadd.f32 %v123_v62, %v122_v63  ;;  %v1327_v63 = vmov 2   ;;  %s1781_s5 = sld [smem:[#allocation2 + $0x9]] }
  0x2e   :  { %153 = vadd.xlane.f32.xlu1 %v152_v0  ;;  %v1470_v12 = vsub.s32 0, %v1467_v10  ;;  %v289_v30 = vsub.s32 1, %v1467_v10  ;;  %v401_v44 = vsub.s32 2, %v1467_v10  ;;  %s1800_s0 = sld [smem:[#allocation2 + $0x8]] }
  0x2f   :  { %v126_v3 = vadd.f32 %v125_v1, %v124_v2  ;;  %s1803_s6 = sld [smem:[#allocation5 + $0x9]] }
  0x30   :  { %s1828_s16 = sld [smem:[#allocation2 + $0xb]] }
  0x31   :  { %127 = vadd.xlane.f32.xlu0 %v126_v3  ;;  %s1861_s17 = sld [smem:[#allocation2 + $0xa]] }
  0x32   :  { %s1863_s3 = sld [smem:[#allocation5 + $0xb]] }
  0x33   :  { %s1897_s18 = sld [smem:[#allocation5 + $0xa]] }
  0x34   :  { %s2072_s24 = sld [smem:[#allocation5 + $0xf]] }
  0x35   :  { %s2084_s25 = sld [smem:[#allocation5 + $0xe]] }
  0x3f   :  { %194 = vbcast.lane.b32.xlu1 %v1153_v4, 264 }
  0x43   :  { %309 = vbcast.lane.b32.xlu1 %v1154_v6, 256 }
  0x47   :  { %190 = vbcast.lane.b32.xlu0 %v1153_v4, 256  ;;  %313 = vbcast.lane.b32.xlu1 %v1154_v6, 264 }
  0x4b   :  { %421 = vbcast.lane.b32.xlu0 %v1155_v7, 256  ;;  %425 = vbcast.lane.b32.xlu1 %v1155_v7, 264 }
  0xb3   :  { %v141_v9 = vpop.xlane.xlu1 %140 }
  0xb4   :  { %v115_v11 = vpop.xlane.xlu0 %114  ;;  %v157_v21 = vmul.f32 0.0013020834, %v141_v9 }
  0xb5   :  { %v155_v13 = vmul.f32 0.0013020834, %v115_v11 }
  0xb6   :  { %v179_v26 = vrot.slane %v157_v21, %v1470_v12  ;;  %v298_v41 = vrot.slane %v157_v21, %v289_v30  ;;  %v410_v56 = vrot.slane %v157_v21, %v401_v44 }
  0xb7   :  { %v154_v14 = vpop.xlane.xlu1 %153  ;;  %v171_v15 = vrot.slane %v155_v13, %v1470_v12  ;;  %v290_v34 = vrot.slane %v155_v13, %v289_v30  ;;  %v402_v49 = vrot.slane %v155_v13, %v401_v44 }
  0xb8   :  { %v158_v24 = vmul.f32 0.0013020834, %v154_v14 }
  0xba   :  { %v128_v16 = vpop.xlane.xlu0 %127  ;;  %v183_v29 = vrot.slane %v158_v24, %v1470_v12  ;;  %v302_v45 = vrot.slane %v158_v24, %v289_v30  ;;  %v414_v59 = vrot.slane %v158_v24, %v401_v44 }
  0xbb   :  { %v156_v17 = vmul.f32 0.0013020834, %v128_v16  ;;  %v195_v18 = vpop.permute.xlu1 %194 }
  0xbc   :  { %v199_v19 = vmul.f32 %v195_v18, %v171_v15  ;;  %v203_v32 = vmul.f32 %v195_v18, %v179_v26  ;;  %v205_v35 = vmul.f32 %v195_v18, %v183_v29 }
  0xbd   :  { %v175_v20 = vrot.slane %v156_v17, %v1470_v12  ;;  %v294_v38 = vrot.slane %v156_v17, %v289_v30  ;;  %v406_v53 = vrot.slane %v156_v17, %v401_v44 }
  0xbe   :  { %v191_v22 = vpop.permute.xlu0 %190  ;;  %218 = vperm.xlu1 %1209, %v199_v19  }
  0xbf   :  { %v198_v23 = vmul.f32 %v191_v22, %v171_v15  ;;  %v200_v25 = vmul.f32 %v191_v22, %v175_v20  ;;  %v201_v27 = vmul.f32 %v195_v18, %v175_v20  ;;  %v202_v28 = vmul.f32 %v191_v22, %v179_v26  ;;  %v310_v31 = vpop.permute.xlu1 %309 }
  0xc0   :  { %v204_v33 = vmul.f32 %v191_v22, %v183_v29  ;;  %v317_v37 = vmul.f32 %v310_v31, %v290_v34  ;;  %v319_v40 = vmul.f32 %v310_v31, %v294_v38  ;;  %v321_v43 = vmul.f32 %v310_v31, %v298_v41 }
  0xc1   :  { %215 = vperm.xlu0 %1208, %v198_v23   ;;  %v323_v47 = vmul.f32 %v310_v31, %v302_v45  ;;  %v239_v15 = vand.u32 127, %v168_v8 }
  0xc2   :  { %221 = vperm.xlu1 %1209, %v200_v25   ;;  %v422_v48 = vpop.permute.xlu0 %421 }
  0xc3   :  { %v314_v36 = vpop.permute.xlu1 %313  ;;  %v429_v52 = vmul.f32 %v422_v48, %v402_v49  ;;  %v431_v55 = vmul.f32 %v422_v48, %v406_v53  ;;  %v433_v58 = vmul.f32 %v422_v48, %v410_v56  ;;  %v435_v61 = vmul.f32 %v422_v48, %v414_v59 }
  0xc4   :  { %v318_v39 = vmul.f32 %v314_v36, %v290_v34  ;;  %v320_v42 = vmul.f32 %v314_v36, %v294_v38  ;;  %v322_v46 = vmul.f32 %v314_v36, %v298_v41  ;;  %v324_v50 = vmul.f32 %v314_v36, %v302_v45 }
  0xc5   :  { %224 = vperm.xlu0 %1208, %v201_v27   ;;  %v244_v18 = vadd.s32 4294967288, %v239_v15  ;;  %v1481_v21 = vsub.s32 %v239_v15, %v1467_v10 }
  0xc6   :  { %227 = vperm.xlu1 %1209, %v202_v28  }
  0xc7   :  { %v426_v51 = vpop.permute.xlu1 %425  ;;  %v247_v22 = vsub.s32 %v244_v18, %v1467_v10 }
  0xc8   :  { %v430_v54 = vmul.f32 %v426_v51, %v402_v49  ;;  %v432_v57 = vmul.f32 %v426_v51, %v406_v53  ;;  %v434_v60 = vmul.f32 %v426_v51, %v410_v56  ;;  %v436_v62 = vmul.f32 %v426_v51, %v414_v59 }
  0xc9   :  { %230 = vperm.xlu0 %1208, %v203_v32  }
  0xca   :  { %233 = vperm.xlu1 %1209, %v204_v33  }
  0xcd   :  { %236 = vperm.xlu0 %1208, %v205_v35  }
  0xce   :  { %334 = vperm.xlu1 %1209, %v317_v37  }
  0xd1   :  { %337 = vperm.xlu0 %1208, %v318_v39  }
  0xd2   :  { %340 = vperm.xlu1 %1209, %v319_v40  }
  0xd5   :  { %343 = vperm.xlu0 %1208, %v320_v42  }
  0xd6   :  { %346 = vperm.xlu1 %1209, %v321_v43  }
  0xd9   :  { %349 = vperm.xlu0 %1208, %v322_v46  }
  0xda   :  { %352 = vperm.xlu1 %1209, %v323_v47  }
  0xdd   :  { %355 = vperm.xlu0 %1208, %v324_v50  }
  0xde   :  { %446 = vperm.xlu1 %1209, %v429_v52  }
  0xe1   :  { %449 = vperm.xlu0 %1208, %v430_v54  }
  0xe2   :  { %452 = vperm.xlu1 %1209, %v431_v55  }
  0xe5   :  { %455 = vperm.xlu0 %1208, %v432_v57  }
  0xe6   :  { %458 = vperm.xlu1 %1209, %v433_v58  }
  0xe9   :  { %461 = vperm.xlu0 %1208, %v434_v60  }
  0xea   :  { %464 = vperm.xlu1 %1209, %v435_v61  }
  0xed   :  { %467 = vperm.xlu0 %1208, %v436_v62   ;;  %v1152_v62 = vld [vmem:[%s2218_s4] ss:$0 sm:$0xff]  ;;  %s1669_s4 = sld [smem:[#allocation2 + $0x1]] }
  0xf1   :  { %1211 = vset.pattern.permute.xlu0 %v1327_v63 }
 0x139   :  { %v219_v0 = vpop.permute.xlu1 %218 }
 0x13a   :  { %v248_v28 = vrot.slane %v219_v0, %v247_v22 }
 0x13c   :  { %v216_v1 = vpop.permute.xlu0 %215 }
 0x13d   :  { %v222_v2 = vpop.permute.xlu1 %221  ;;  %v243_v8 = vrot.slane %v216_v1, %v1481_v21 }
 0x13e   :  { %v254_v25 = vrot.slane %v222_v2, %v1481_v21 }
 0x13f   :  { %v250_v42 = vsel %vm249_vm1, %v248_v28, %v243_v8 }
 0x140   :  { %v225_v3 = vpop.permute.xlu0 %224 }
 0x141   :  { %v228_v4 = vpop.permute.xlu1 %227  ;;  %v258_v26 = vrot.slane %v225_v3, %v247_v22 }
 0x142   :  { %v263_v29 = vrot.slane %v228_v4, %v1481_v21 }
 0x143   :  { %v259_v32 = vsel %vm249_vm1, %v258_v26, %v254_v25  ;;  %v1328_v26 = vmov 1966171168  }
 0x144   :  { %v231_v6 = vpop.permute.xlu0 %230  ;;  %v279_v47 = vsel %vm278_vm2, %v259_v32, %v250_v42  ;;  %v1329_v32 = vmov 3  }
 0x145   :  { %v234_v7 = vpop.permute.xlu1 %233  ;;  %v267_v30 = vrot.slane %v231_v6, %v247_v22 }
 0x146   :  { %v272_v33 = vrot.slane %v234_v7, %v1481_v21 }
 0x147   :  { %v268_v43 = vsel %vm249_vm1, %v267_v30, %v263_v29 }
 0x148   :  { %v237_v9 = vpop.permute.xlu0 %236  ;;  %v281_v52 = vsel %vm280_vm3, %v268_v43, %v279_v47 }
 0x149   :  { %v335_v11 = vpop.permute.xlu1 %334  ;;  %v276_v34 = vrot.slane %v237_v9, %v247_v22 }
 0x14a   :  { %v360_v37 = vrot.slane %v335_v11, %v1481_v21 }
 0x14b   :  { %v277_v48 = vsel %vm249_vm1, %v276_v34, %v272_v33  ;;  %v1330_v33 = vmov 1   ;;  %v1332_v34 = vmov 4  }
 0x14c   :  { %v338_v13 = vpop.permute.xlu0 %337  ;;  %v283_v0 = vsel %vm282_vm4, %v277_v48, %v281_v52 }
 0x14d   :  { %v341_v14 = vpop.permute.xlu1 %340  ;;  %v364_v38 = vrot.slane %v338_v13, %v247_v22  ;;  %v285_v11 = vadd.f32 %v1152_v62, %v283_v0 }
 0x14e   :  { %v369_v35 = vrot.slane %v341_v14, %v1481_v21 }
 0x14f   :  { %v365_v53 = vsel %vm249_vm1, %v364_v38, %v360_v37  ;;  %v1335_v37 = vmov 9   ;;  %v1336_v38 = vmov 8  }
 0x150   :  { %v344_v16 = vpop.permute.xlu0 %343 }
 0x151   :  { %v347_v17 = vpop.permute.xlu1 %346  ;;  %v373_v36 = vrot.slane %v344_v16, %v247_v22 }
 0x152   :  { %v378_v39 = vrot.slane %v347_v17, %v1481_v21 }
 0x153   :  { %v374_v49 = vsel %vm249_vm1, %v373_v36, %v369_v35  ;;  %v1333_v35 = vmov 7   ;;  %v1334_v36 = vmov 6  }
 0x154   :  { %v350_v19 = vpop.permute.xlu0 %349  ;;  %v393_v1 = vsel %vm278_vm2, %v374_v49, %v365_v53 }
 0x155   :  { %v353_v20 = vpop.permute.xlu1 %352  ;;  %v382_v40 = vrot.slane %v350_v19, %v247_v22 }
 0x156   :  { %v387_v44 = vrot.slane %v353_v20, %v1481_v21 }
 0x157   :  { %v383_v54 = vsel %vm249_vm1, %v382_v40, %v378_v39  ;;  %v1337_v39 = vmov 11   ;;  %v1338_v40 = vmov 10  }
 0x158   :  { %v356_v23 = vpop.permute.xlu0 %355  ;;  %v394_v2 = vsel %vm280_vm3, %v383_v54, %v393_v1 }
 0x159   :  { %v447_v24 = vpop.permute.xlu1 %446  ;;  %v391_v45 = vrot.slane %v356_v23, %v247_v22 }
 0x15a   :  { %v472_v58 = vrot.slane %v447_v24, %v1481_v21 }
 0x15b   :  { %v392_v57 = vsel %vm249_vm1, %v391_v45, %v387_v44  ;;  %v1339_v44 = vmov 13   ;;  %v1340_v45 = vmov 12  }
 0x15c   :  { %v450_v27 = vpop.permute.xlu0 %449  ;;  %v395_v6 = vsel %vm282_vm4, %v392_v57, %v394_v2 }
 0x15d   :  { %v453_v31 = vpop.permute.xlu1 %452  ;;  %v476_v59 = vrot.slane %v450_v27, %v247_v22  ;;  %v397_v16 = vadd.f32 %v395_v6, %v285_v11  ;;  %v518_v27 = vunpack.c.l.s4 %v1328_v26  ;;  %v1697_v6 = vld [vmem:[%s2215_s1] sm:$0xff] }
 0x15e   :  { %v481_v50 = vrot.slane %v453_v31, %v1481_v21 }
 0x15f   :  { %v477_v13 = vsel %vm249_vm1, %v476_v59, %v472_v58  ;;  %v519_v28 = vunpack.c.0.s8 %v518_v27 }
 0x160   :  { %v456_v41 = vpop.permute.xlu0 %455 }
 0x161   :  { %v459_v46 = vpop.permute.xlu1 %458  ;;  %v485_v51 = vrot.slane %v456_v41, %v247_v22 }
 0x162   :  { %v490_v55 = vrot.slane %v459_v46, %v1481_v21 }
 0x163   :  { %v486_v3 = vsel %vm249_vm1, %v485_v51, %v481_v50 }
 0x164   :  { %v462_v56 = vpop.permute.xlu0 %461  ;;  %v505_v15 = vsel %vm278_vm2, %v486_v3, %v477_v13 }
 0x165   :  { %v494_v60 = vrot.slane %v462_v56, %v247_v22  ;;  %v465_v61 = vpop.permute.xlu1 %464 }
 0x166   :  { %v499_v4 = vrot.slane %v465_v61, %v1481_v21 }
 0x167   :  { %v495_v7 = vsel %vm249_vm1, %v494_v60, %v490_v55 }
 0x168   :  { %v468_v9 = vpop.permute.xlu0 %467  ;;  %v506_v17 = vsel %vm280_vm3, %v495_v7, %v505_v15  ;;  %v544_v7 = vstv %s1676_s19  ;;  %s1955_s19 = sld [smem:[#allocation2 + $0xd]] }
 0x169   :  { %v503_v14 = vrot.slane %v468_v9, %v247_v22  ;;  %v522_v22 = vsub.s32 %v519_v28, %v1467_v10  ;;  %v1331_v10 = vmov 5   ;;  %v545_v15 = vmul.f32 %v544_v7, %v1697_v6 }
 0x16b   :  { %v504_v18 = vsel %vm249_vm1, %v503_v14, %v499_v4  ;;  %v594_v4 = vstv %s1669_s4  ;;  %v598_v14 = vstv %s1678_s20  ;;  %s1942_s4 = sld [smem:[#allocation2 + $0xc]] }
 0x16c   :  { %v507_v19 = vsel %vm282_vm4, %v504_v18, %v506_v17  ;;  %v595_v13 = vmul.f32 %v594_v4, %v1697_v6  ;;  %v548_v17 = vstv %s1688_s22  ;;  %s1981_s20 = sld [smem:[#allocation5 + $0xc]] }
 0x16d   :  { %v509_v20 = vadd.f32 %v507_v19, %v397_v16  ;;  %v628_v16 = vstv %s1681_s21  ;;  %s2000_s21 = sld [smem:[#allocation5 + $0xd]] }
 0x16e   :  { %v1725_v19 = vadd.f32 %v598_v14, %v595_v13  ;;  %v2225_v13 = vstv %s1766_s12  ;;  %s2045_s22 = sld [smem:[#allocation2 + $0xf]] }
 0x16f   :  { %v510_v21 = vsub.f32 0.0, %v509_v20 }
 0x170   :  { %v601_v26 = vmax.f32 %v1725_v19, 0.0 }
 0x171   :  { %v511_v23 = vmul.f32 1.442695, %v510_v21  ;;  %v629_v21 = vmul.f32 %v628_v16, %v1697_v6 }
 0x173   :  { %1282 = vpow2.f32 %v511_v23  ;;  %v1739_v23 = vadd.f32 %v548_v17, %v545_v15  ;;  %v2227_v15 = vstv %s1768_s13 }
 0x180   :  { %v1283_v24 = vpop.eup %1282 }
 0x181   :  { %v513_v25 = vadd.f32 1.0, %v1283_v24  ;;  %v662_v24 = vstv %s1691_s23  ;;  %s2050_s23 = sld [smem:[#allocation2 + $0xe]] }
 0x182   :  { %v663_v28 = vmul.f32 %v662_v24, %v1697_v6 }
 0x183   :  { %1284 = vrcp.f32 %v513_v25  ;;  %v632_v25 = vstv %s1699_s26 }
 0x190   :  { %v1285_v8 = vpop.eup %1284 }
 0x191   :  { %v523_v29 = vrot.slane %v1285_v8, %v522_v22 }
 0x193   :  { %v531_v30 = vrot.slane %v523_v29, %v522_v22  ;;  %v524_v41 = vcombine.high %v523_v29, %v523_v29  ;;  %v1762_v29 = vadd.f32 %v632_v25, %v629_v21 }
 0x195   :  { %v1522_v31 = vrot.slane %v531_v30, %v1470_v12  ;;  %v538_v42 = vrot.slane %v524_v41, %v522_v22  ;;  %v539_v43 = vcombine.high %v531_v30, %v531_v30  ;;  %v696_v22 = vstv %s1711_s27 }
 0x196   :  { %v551_v30 = vmax.f32 %v1739_v23, 0.0  ;;  %v2224_v41 = vstv %s1745_s10 }
 0x197   :  { %638 = vperm.xlu0 %1211, %v1522_v31   ;;  %570 = vperm.xlu1 %1209, %v1522_v31   ;;  %v1551_v46 = vrot.slane %v538_v42, %v1470_v12  ;;  %v1554_v47 = vrot.slane %v539_v43, %v1470_v12  ;;  %v540_v48 = vcombine.high %v538_v42, %v538_v42 }
 0x199   :  { %v1604_v49 = vrot.slane %v540_v48, %v1470_v12  ;;  %v1341_v12 = vmov 14   ;;  %v765_v48 = vmul.f32 %v2224_v41, %v1697_v6 }
 0x19b   :  { %1212 = vset.pattern.permute.xlu0 %v1329_v32  ;;  %1210 = vset.pattern.permute.xlu1 %v1330_v33  ;;  %v1859_v41 = vadd.f32 %v2227_v15, %v765_v48 }
 0x19c   :  { %672 = vperm.xlu0 %1212, %v1522_v31   ;;  %604 = vperm.xlu1 %1210, %v1522_v31  }
 0x1a0   :  { %1214 = vset.pattern.permute.xlu0 %v1331_v10  ;;  %1213 = vset.pattern.permute.xlu1 %v1332_v34 }
 0x1a1   :  { %740 = vperm.xlu0 %1214, %v1522_v31   ;;  %706 = vperm.xlu1 %1213, %v1522_v31  }
 0x1a5   :  { %1216 = vset.pattern.permute.xlu0 %v1333_v35  ;;  %1215 = vset.pattern.permute.xlu1 %v1334_v36 }
 0x1a6   :  { %808 = vperm.xlu0 %1216, %v1522_v31   ;;  %774 = vperm.xlu1 %1215, %v1522_v31  }
 0x1aa   :  { %1218 = vset.pattern.permute.xlu0 %v1335_v37  ;;  %1217 = vset.pattern.permute.xlu1 %v1336_v38 }
 0x1ab   :  { %876 = vperm.xlu0 %1218, %v1522_v31   ;;  %842 = vperm.xlu1 %1217, %v1522_v31  }
 0x1af   :  { %1220 = vset.pattern.permute.xlu0 %v1337_v39  ;;  %1219 = vset.pattern.permute.xlu1 %v1338_v40 }
 0x1b0   :  { %944 = vperm.xlu0 %1220, %v1522_v31   ;;  %910 = vperm.xlu1 %1219, %v1522_v31  }
 0x1b4   :  { %1222 = vset.pattern.permute.xlu0 %v1339_v44  ;;  %1221 = vset.pattern.permute.xlu1 %v1340_v45 }
 0x1b5   :  { %1012 = vperm.xlu0 %1222, %v1522_v31   ;;  %978 = vperm.xlu1 %1221, %v1522_v31  }
 0x1b9   :  { %1223 = vset.pattern.permute.xlu0 %v1326_v5  ;;  %1224 = vset.pattern.permute.xlu1 %v1326_v5 }
 0x1ba   :  { %578 = vperm.xlu1 %1224, %v1554_v47   ;;  %574 = vperm.xlu0 %1223, %v1551_v46  }
 0x1be   :  { %1226 = vset.pattern.permute.xlu1 %v1330_v33  ;;  %1225 = vset.pattern.permute.xlu0 %v1330_v33 }
 0x1bf   :  { %612 = vperm.xlu1 %1226, %v1554_v47   ;;  %608 = vperm.xlu0 %1225, %v1551_v46  }
 0x1c3   :  { %1227 = vset.pattern.permute.xlu1 %v1327_v63  ;;  %1229 = vset.pattern.permute.xlu0 %v1329_v32 }
 0x1c4   :  { %642 = vperm.xlu1 %1227, %v1551_v46   ;;  %680 = vperm.xlu0 %1229, %v1554_v47  }
 0x1c8   :  { %646 = vperm.xlu1 %1227, %v1554_v47   ;;  %1230 = vset.pattern.permute.xlu0 %v1332_v34 }
 0x1c9   :  { %710 = vperm.xlu0 %1230, %v1551_v46  }
 0x1cc   :  { %1228 = vset.pattern.permute.xlu1 %v1329_v32 }
 0x1cd   :  { %676 = vperm.xlu1 %1228, %v1551_v46   ;;  %1233 = vset.pattern.permute.xlu0 %v1331_v10 }
 0x1ce   :  { %748 = vperm.xlu0 %1233, %v1554_v47  }
 0x1d1   :  { %1231 = vset.pattern.permute.xlu1 %v1332_v34 }
 0x1d2   :  { %714 = vperm.xlu1 %1231, %v1554_v47   ;;  %1234 = vset.pattern.permute.xlu0 %v1334_v36 }
 0x1d3   :  { %778 = vperm.xlu0 %1234, %v1551_v46  }
 0x1d6   :  { %1232 = vset.pattern.permute.xlu1 %v1331_v10 }
 0x1d7   :  { %744 = vperm.xlu1 %1232, %v1551_v46   ;;  %1237 = vset.pattern.permute.xlu0 %v1333_v35 }
 0x1d8   :  { %816 = vperm.xlu0 %1237, %v1554_v47  }
 0x1db   :  { %1235 = vset.pattern.permute.xlu1 %v1334_v36 }
 0x1dc   :  { %782 = vperm.xlu1 %1235, %v1554_v47   ;;  %1238 = vset.pattern.permute.xlu0 %v1336_v38 }
 0x1dd   :  { %846 = vperm.xlu0 %1238, %v1551_v46  }
 0x1e0   :  { %1236 = vset.pattern.permute.xlu1 %v1333_v35 }
 0x1e1   :  { %812 = vperm.xlu1 %1236, %v1551_v46   ;;  %1241 = vset.pattern.permute.xlu0 %v1335_v37 }
 0x1e2   :  { %884 = vperm.xlu0 %1241, %v1554_v47  }
 0x1e5   :  { %1239 = vset.pattern.permute.xlu1 %v1336_v38 }
 0x1e6   :  { %850 = vperm.xlu1 %1239, %v1554_v47   ;;  %1242 = vset.pattern.permute.xlu0 %v1338_v40 }
 0x1e7   :  { %914 = vperm.xlu0 %1242, %v1551_v46  }
 0x1ea   :  { %1240 = vset.pattern.permute.xlu1 %v1335_v37 }
 0x1eb   :  { %880 = vperm.xlu1 %1240, %v1551_v46   ;;  %1245 = vset.pattern.permute.xlu0 %v1337_v39 }
 0x1ec   :  { %952 = vperm.xlu0 %1245, %v1554_v47  }
 0x1ef   :  { %1243 = vset.pattern.permute.xlu1 %v1338_v40 }
 0x1f0   :  { %918 = vperm.xlu1 %1243, %v1554_v47   ;;  %1246 = vset.pattern.permute.xlu0 %v1340_v45 }
 0x1f1   :  { %982 = vperm.xlu0 %1246, %v1551_v46  }
 0x1f4   :  { %1244 = vset.pattern.permute.xlu1 %v1337_v39 }
 0x1f5   :  { %948 = vperm.xlu1 %1244, %v1551_v46   ;;  %1249 = vset.pattern.permute.xlu0 %v1326_v5  ;;  %v1342_v5 = vmov 15  }
 0x1f6   :  { %582 = vperm.xlu0 %1249, %v1604_v49  }
 0x1f9   :  { %1247 = vset.pattern.permute.xlu1 %v1340_v45 }
 0x1fa   :  { %986 = vperm.xlu1 %1247, %v1554_v47   ;;  %1250 = vset.pattern.permute.xlu0 %v1339_v44 }
 0x1fb   :  { %1020 = vperm.xlu0 %1250, %v1554_v47  }
 0x1fe   :  { %1248 = vset.pattern.permute.xlu1 %v1339_v44 }
 0x1ff   :  { %1016 = vperm.xlu1 %1248, %v1551_v46   ;;  %1252 = vset.pattern.permute.xlu0 %v1341_v12 }
 0x200   :  { %1050 = vperm.xlu0 %1252, %v1551_v46  }
 0x203   :  { %1251 = vset.pattern.permute.xlu1 %v1341_v12 }
 0x204   :  { %1046 = vperm.xlu1 %1251, %v1522_v31   ;;  %1253 = vset.pattern.permute.xlu0 %v1342_v5 }
 0x205   :  { %1080 = vperm.xlu0 %1253, %v1522_v31   ;;  %v666_v31 = vstv %s1716_s28 }
 0x208   :  { %1054 = vperm.xlu1 %1251, %v1554_v47  }
 0x209   :  { %1088 = vperm.xlu0 %1253, %v1554_v47  }
 0x20c   :  { %1254 = vset.pattern.permute.xlu1 %v1342_v5 }
 0x20d   :  { %1084 = vperm.xlu1 %1254, %v1551_v46  }
 0x211   :  { %1255 = vset.pattern.permute.xlu1 %v1330_v33  ;;  %v697_v33 = vmul.f32 %v696_v22, %v1697_v6 }
 0x212   :  { %v1627_v50 = vpop.permute.xlu0 %638  ;;  %v1629_v51 = vpop.permute.xlu1 %570  ;;  %616 = vperm.xlu1 %1255, %v1604_v49  }
 0x216   :  { %1256 = vset.pattern.permute.xlu1 %v1327_v63 }
 0x217   :  { %v1633_v52 = vpop.permute.xlu0 %672  ;;  %v1635_v53 = vpop.permute.xlu1 %604  ;;  %650 = vperm.xlu1 %1256, %v1604_v49  }
 0x21b   :  { %1257 = vset.pattern.permute.xlu1 %v1329_v32  ;;  %v619_v32 = vmul.f32 %v1635_v53, %v601_v26 }
 0x21c   :  { %v1639_v54 = vpop.permute.xlu0 %740  ;;  %v1641_v55 = vpop.permute.xlu1 %706  ;;  %684 = vperm.xlu1 %1257, %v1604_v49  }
 0x220   :  { %1258 = vset.pattern.permute.xlu1 %v1332_v34  ;;  %v700_v34 = vstv %s1732_s30 }
 0x221   :  { %v1645_v56 = vpop.permute.xlu0 %808  ;;  %v1647_v57 = vpop.permute.xlu1 %774  ;;  %718 = vperm.xlu1 %1258, %v1604_v49   ;;  %v1798_v43 = vadd.f32 %v700_v34, %v697_v33 }
 0x223   :  { %v2228_v33 = vmax.f32 %v1798_v43, 0.0 }
 0x225   :  { %1259 = vset.pattern.permute.xlu1 %v1331_v10  ;;  %v1778_v10 = vadd.f32 %v666_v31, %v663_v28 }
 0x226   :  { %v1651_v63 = vpop.permute.xlu0 %876  ;;  %v1653_v58 = vpop.permute.xlu1 %842  ;;  %752 = vperm.xlu1 %1259, %v1604_v49  }
 0x22a   :  { %1260 = vset.pattern.permute.xlu1 %v1334_v36  ;;  %v635_v36 = vmax.f32 %v1762_v29, 0.0 }
 0x22b   :  { %v1657_v59 = vpop.permute.xlu0 %944  ;;  %v1659_v60 = vpop.permute.xlu1 %910  ;;  %786 = vperm.xlu1 %1260, %v1604_v49  }
 0x22f   :  { %1261 = vset.pattern.permute.xlu1 %v1333_v35 }
 0x230   :  { %v1663_v61 = vpop.permute.xlu0 %1012  ;;  %v1665_v62 = vpop.permute.xlu1 %978  ;;  %820 = vperm.xlu1 %1261, %v1604_v49  }
 0x234   :  { %1262 = vset.pattern.permute.xlu1 %v1336_v38 }
 0x235   :  { %v1671_v0 = vpop.permute.xlu1 %578  ;;  %v1673_v1 = vpop.permute.xlu0 %574  ;;  %854 = vperm.xlu1 %1262, %v1604_v49  }
 0x239   :  { %1263 = vset.pattern.permute.xlu1 %v1335_v37  ;;  %v585_v37 = vmul.f32 %v1629_v51, %v551_v30  ;;  %v1820_v51 = vld [vmem:[%s2215_s1 + $0x8] sm:$0xff]  ;;  %s1837_s1 = sld [smem:[#allocation5 + $0x8]] }
 0x23a   :  { %v1683_v2 = vpop.permute.xlu1 %612  ;;  %v1685_v3 = vpop.permute.xlu0 %608  ;;  %888 = vperm.xlu1 %1263, %v1604_v49   ;;  %v596_v21 = vmul.f32 %v594_v4, %v1820_v51 }
 0x23b   :  { %v623_v42 = vadd.f32 %v619_v32, %v585_v37  ;;  %v546_v37 = vmul.f32 %v544_v7, %v1820_v51 }
 0x23c   :  { %v1867_v7 = vadd.f32 %v598_v14, %v596_v21  ;;  %v2229_v14 = vstv %s1800_s0 }
 0x23e   :  { %1264 = vset.pattern.permute.xlu1 %v1338_v40  ;;  %v2223_v40 = vstv %s1742_s9 }
 0x23f   :  { %v1702_v9 = vpop.permute.xlu1 %642  ;;  %v1704_v11 = vpop.permute.xlu0 %680  ;;  %922 = vperm.xlu1 %1264, %v1604_v49   ;;  %v799_v47 = vmul.f32 %v2223_v40, %v1697_v6  ;;  %v630_v40 = vmul.f32 %v628_v16, %v1820_v51  ;;  %v836_v15 = vstv %s1837_s1 }
 0x243   :  { %v1720_v18 = vpop.permute.xlu1 %646  ;;  %1265 = vset.pattern.permute.xlu1 %v1337_v39  ;;  %v730_v39 = vstv %s1727_s29 }
 0x244   :  { %v1729_v20 = vpop.permute.xlu0 %710  ;;  %956 = vperm.xlu1 %1265, %v1604_v49   ;;  %v731_v46 = vmul.f32 %v730_v39, %v1697_v6 }
 0x248   :  { %v1748_v27 = vpop.permute.xlu1 %676  ;;  %1266 = vset.pattern.permute.xlu1 %v1340_v45  ;;  %v653_v45 = vmul.f32 %v1627_v50, %v635_v36  ;;  %v734_v50 = vstv %s1754_s11 }
 0x249   :  { %v1757_v8 = vpop.permute.xlu0 %748  ;;  %990 = vperm.xlu1 %1266, %v1604_v49  }
 0x24a   :  { %v657_v32 = vadd.f32 %v653_v45, %v623_v42  ;;  %v1851_v42 = vadd.f32 %v734_v50, %v731_v46  ;;  %v1855_v45 = vadd.f32 %v2225_v13, %v799_v47  ;;  %v721_v47 = vmul.f32 %v1641_v55, %v2228_v33 }
 0x24b   :  { %v1888_v13 = vadd.f32 %v548_v17, %v546_v37  ;;  %v2233_v17 = vmax.f32 %v1867_v7, 0.0 }
 0x24c   :  { %v737_v55 = vmax.f32 %v1851_v42, 0.0 }
 0x24d   :  { %v1783_v35 = vpop.permute.xlu1 %714  ;;  %1267 = vset.pattern.permute.xlu1 %v1339_v44  ;;  %v2230_v44 = vmax.f32 %v1778_v10, 0.0 }
 0x24e   :  { %v1790_v38 = vpop.permute.xlu0 %778  ;;  %1024 = vperm.xlu1 %1267, %v1604_v49   ;;  %v755_v19 = vmul.f32 %v1639_v54, %v737_v55  ;;  %v620_v54 = vmul.f32 %v1685_v3, %v2233_v17  ;;  %v2242_v17 = vstv %s1766_s12 }
 0x24f   :  { %v687_v4 = vmul.f32 %v1633_v52, %v2230_v44  ;;  %v664_v52 = vmul.f32 %v662_v24, %v1820_v51  ;;  %v870_v24 = vstv %s1803_s6 }
 0x251   :  { %v691_v46 = vadd.f32 %v687_v4, %v657_v32  ;;  %v771_v4 = vmax.f32 %v1859_v41, 0.0  ;;  %v621_v32 = vmul.f32 %v1683_v2, %v601_v26  ;;  %v587_v26 = vmul.f32 %v1671_v0, %v551_v30 }
 0x252   :  { %v1822_v53 = vpop.permute.xlu1 %744  ;;  %1268 = vset.pattern.permute.xlu1 %v1341_v12  ;;  %v2226_v12 = vstv %s1781_s5 }
 0x253   :  { %v1833_v28 = vpop.permute.xlu0 %816  ;;  %1058 = vperm.xlu1 %1268, %v1604_v49   ;;  %v867_v48 = vmul.f32 %v2226_v12, %v1697_v6  ;;  %v934_v12 = vstv %s1828_s16  ;;  %v789_v0 = vmul.f32 %v1647_v57, %v771_v4 }
 0x254   :  { %v935_v2 = vmul.f32 %v934_v12, %v1697_v6 }
 0x255   :  { %v1910_v37 = vadd.f32 %v870_v24, %v867_v48 }
 0x257   :  { %v1872_v16 = vpop.permute.xlu1 %782  ;;  %1269 = vset.pattern.permute.xlu1 %v1342_v5  ;;  %v1892_v5 = vadd.f32 %v632_v25, %v630_v40  ;;  %v1906_v25 = vadd.f32 %v666_v31, %v664_v52  ;;  %v725_v40 = vadd.f32 %v721_v47, %v691_v46  ;;  %v698_v31 = vmul.f32 %v696_v22, %v1820_v51 }
 0x258   :  { %v1882_v21 = vpop.permute.xlu0 %846  ;;  %1092 = vperm.xlu1 %1269, %v1604_v49   ;;  %v833_v49 = vmul.f32 %v2229_v14, %v1697_v6  ;;  %v2235_v14 = vmax.f32 %v1888_v13, 0.0  ;;  %v732_v52 = vmul.f32 %v730_v39, %v1820_v51  ;;  %v655_v22 = vmul.f32 %v1720_v18, %v635_v36 }
 0x259   :  { %v2231_v44 = vmax.f32 %v1892_v5, 0.0  ;;  %v2234_v39 = vstv %s1863_s3  ;;  %v900_v47 = vstv %s1861_s17  ;;  %v2232_v48 = vmax.f32 %v1906_v25, 0.0 }
 0x25a   :  { %v759_v23 = vadd.f32 %v755_v19, %v725_v40  ;;  %v1953_v29 = vadd.f32 %v836_v15, %v833_v49  ;;  %v625_v18 = vadd.f32 %v621_v32, %v587_v26  ;;  %v586_v30 = vmul.f32 %v1673_v1, %v2235_v14 }
 0x25b   :  { %v654_v3 = vmul.f32 %v1702_v9, %v2231_v44  ;;  %v1965_v36 = vadd.f32 %v700_v34, %v698_v31  ;;  %v1969_v57 = vadd.f32 %v734_v50, %v732_v52  ;;  %v1975_v40 = vadd.f32 %v2234_v39, %v935_v2 }
 0x25c   :  { %v1916_v33 = vpop.permute.xlu1 %812  ;;  %v901_v32 = vmul.f32 %v900_v47, %v1697_v6  ;;  %v904_v19 = vstv %s1897_s18  ;;  %v659_v26 = vadd.f32 %v655_v22, %v625_v18  ;;  %v624_v9 = vadd.f32 %v620_v54, %v586_v30 }
 0x25d   :  { %v1926_v46 = vpop.permute.xlu0 %884  ;;  %v688_v34 = vmul.f32 %v1748_v27, %v2232_v48  ;;  %v2236_v50 = vstv %s1745_s10  ;;  %v2237_v52 = vstv %s1742_s9  ;;  %v793_v44 = vadd.f32 %v789_v0, %v759_v23 }
 0x25e   :  { %v766_v31 = vmul.f32 %v2236_v50, %v1820_v51  ;;  %v800_v2 = vmul.f32 %v2237_v52, %v1820_v51  ;;  %v839_v22 = vmax.f32 %v1953_v29, 0.0  ;;  %v2238_v18 = vmax.f32 %v1778_v10, 0.0 }
 0x25f   :  { %v2239_v30 = vmax.f32 %v1798_v43, 0.0  ;;  %v873_v48 = vmax.f32 %v1910_v37, 0.0  ;;  %v658_v50 = vadd.f32 %v654_v3, %v624_v9  ;;  %v704_v23 = vmax.f32 %v1965_v36, 0.0 }
 0x260   :  { %v689_v54 = vmul.f32 %v1704_v11, %v2238_v18  ;;  %v738_v0 = vmax.f32 %v1969_v57, 0.0  ;;  %v2240_v29 = vmax.f32 %v1855_v45, 0.0  ;;  %v2008_v43 = vadd.f32 %v904_v19, %v901_v32 }
 0x261   :  { %v1971_v49 = vpop.permute.xlu1 %850  ;;  %v723_v27 = vmul.f32 %v1783_v35, %v2239_v30  ;;  %v968_v18 = vstv %s1942_s4  ;;  %v692_v30 = vadd.f32 %v688_v34, %v658_v50  ;;  %v2241_v3 = vstv %s1768_s13 }
 0x262   :  { %v1979_v1 = vpop.permute.xlu0 %914  ;;  %v823_v10 = vmul.f32 %v1645_v56, %v2240_v29  ;;  %v693_v35 = vadd.f32 %v689_v54, %v659_v26  ;;  %v2015_v9 = vadd.f32 %v2241_v3, %v766_v31  ;;  %v2019_v39 = vadd.f32 %v2242_v17, %v800_v2 }
 0x263   :  { %v857_v29 = vmul.f32 %v1653_v58, %v839_v22  ;;  %v1002_v11 = vstv %s1955_s19  ;;  %v722_v26 = vmul.f32 %v1729_v20, %v704_v23  ;;  %v756_v34 = vmul.f32 %v1822_v53, %v738_v0 }
 0x264   :  { %v827_v56 = vadd.f32 %v823_v10, %v793_v44  ;;  %v727_v32 = vadd.f32 %v723_v27, %v693_v35  ;;  %v2243_v31 = vstv %s1800_s0  ;;  %v2244_v17 = vstv %s1781_s5 }
 0x265   :  { %v834_v54 = vmul.f32 %v2243_v31, %v1820_v51  ;;  %v868_v2 = vmul.f32 %v2244_v17, %v1820_v51  ;;  %v969_v44 = vmul.f32 %v968_v18, %v1697_v6  ;;  %v757_v58 = vmul.f32 %v1757_v8, %v737_v55 }
 0x266   :  { %v2010_v52 = vpop.permute.xlu1 %880  ;;  %v791_v20 = vmul.f32 %v1872_v16, %v771_v4  ;;  %v902_v53 = vmul.f32 %v900_v47, %v1820_v51  ;;  %v972_v27 = vstv %s1981_s20  ;;  %v772_v50 = vmax.f32 %v2015_v9, 0.0 }
 0x267   :  { %v2021_v14 = vpop.permute.xlu0 %952  ;;  %v726_v10 = vadd.f32 %v722_v26, %v692_v30  ;;  %v806_v35 = vmax.f32 %v2019_v39, 0.0  ;;  %v861_v8 = vadd.f32 %v857_v29, %v827_v56  ;;  %v907_v41 = vmax.f32 %v2008_v43, 0.0 }
 0x268   :  { %v1003_v16 = vmul.f32 %v1002_v11, %v1697_v6  ;;  %v761_v55 = vadd.f32 %v757_v58, %v727_v32  ;;  %v1006_v47 = vstv %s2000_s21  ;;  %v2059_v31 = vadd.f32 %v836_v15, %v834_v54 }
 0x269   :  { %v760_v3 = vadd.f32 %v756_v34, %v726_v10  ;;  %v2063_v30 = vadd.f32 %v870_v24, %v868_v2  ;;  %v891_v56 = vmul.f32 %v1651_v63, %v873_v48  ;;  %v2068_v29 = vadd.f32 %v972_v27, %v969_v44 }
 0x26a   :  { %v795_v43 = vadd.f32 %v791_v20, %v761_v55  ;;  %v2070_v26 = vadd.f32 %v904_v19, %v902_v53  ;;  %v790_v32 = vmul.f32 %v1790_v38, %v772_v50  ;;  %v824_v15 = vmul.f32 %v1916_v33, %v806_v35 }
 0x26b   :  { %v919_v42 = vpop.permute.xlu1 %918  ;;  %v970_v24 = vmul.f32 %v968_v18, %v1820_v51  ;;  %v936_v63 = vmul.f32 %v934_v12, %v1820_v51  ;;  %v895_v19 = vadd.f32 %v891_v56, %v861_v8  ;;  %v925_v34 = vmul.f32 %v1659_v60, %v907_v41 }
 0x26c   :  { %v2054_v4 = vpop.permute.xlu0 %982  ;;  %v2245_v54 = vmax.f32 %v1855_v45, 0.0  ;;  %v859_v17 = vmul.f32 %v1971_v49, %v839_v22  ;;  %v1007_v2 = vadd.f32 %v1006_v47, %v1003_v16  ;;  %v840_v18 = vmax.f32 %v2059_v31, 0.0 }
 0x26d   :  { %v794_v44 = vadd.f32 %v790_v32, %v760_v3  ;;  %v874_v12 = vmax.f32 %v2063_v30, 0.0  ;;  %v975_v20 = vmax.f32 %v2068_v29, 0.0  ;;  %v2246_v60 = vmax.f32 %v1888_v13, 0.0 }
 0x26e   :  { %v825_v38 = vmul.f32 %v1833_v28, %v2245_v54  ;;  %v1070_v45 = vstv %s2045_s22  ;;  %v908_v28 = vmax.f32 %v2070_v26, 0.0  ;;  %v2247_v49 = vstv %s1863_s3 }
 0x26f   :  { %v828_v8 = vadd.f32 %v824_v15, %v794_v44  ;;  %v2102_v22 = vadd.f32 %v2247_v49, %v936_v63  ;;  %v1036_v16 = vstv %s2050_s23  ;;  %v929_v55 = vadd.f32 %v925_v34, %v895_v19 }
 0x270   :  { %v949_v33 = vpop.permute.xlu1 %948  ;;  %v829_v53 = vadd.f32 %v825_v38, %v795_v43  ;;  %v2105_v56 = vadd.f32 %v972_v27, %v970_v24  ;;  %v1037_v29 = vmul.f32 %v1036_v16, %v1697_v6  ;;  %v858_v13 = vmul.f32 %v1882_v21, %v840_v18 }
 0x271   :  { %v583_v58 = vpop.permute.xlu0 %582  ;;  %v892_v43 = vmul.f32 %v2010_v52, %v874_v12  ;;  %v1004_v15 = vmul.f32 %v1002_v11, %v1820_v51  ;;  %v1071_v63 = vmul.f32 %v1070_v45, %v1697_v6  ;;  %v2248_v19 = vmax.f32 %v1975_v40, 0.0 }
 0x272   :  { %v2096_v10 = vmul.f32 %v583_v58, %v2246_v60  ;;  %v863_v3 = vadd.f32 %v859_v17, %v829_v53  ;;  %v893_v24 = vmul.f32 %v1926_v46, %v873_v48  ;;  %v927_v34 = vmul.f32 %v919_v42, %v907_v41 }
 0x273   :  { %v959_v27 = vmul.f32 %v1657_v59, %v2248_v19  ;;  %v1074_v21 = vstv %s2072_s24  ;;  %v862_v38 = vadd.f32 %v858_v13, %v828_v8  ;;  %v942_v17 = vmax.f32 %v2102_v22, 0.0 }
 0x274   :  { %v1038_v52 = vmul.f32 %v1036_v16, %v1820_v51  ;;  %v1040_v44 = vstv %s2084_s25  ;;  %v993_v6 = vmul.f32 %v1665_v62, %v975_v20  ;;  %v897_v58 = vadd.f32 %v893_v24, %v863_v3 }
 0x275   :  { %v987_v32 = vpop.permute.xlu1 %986  ;;  %v963_v11 = vadd.f32 %v959_v27, %v929_v55  ;;  %v1041_v53 = vadd.f32 %v1040_v44, %v1037_v29  ;;  %v896_v60 = vadd.f32 %v892_v43, %v862_v38  ;;  %v2127_v59 = vadd.f32 %v1006_v47, %v1004_v15 }
 0x276   :  { %v1021_v54 = vpop.permute.xlu0 %1020  ;;  %v1075_v37 = vadd.f32 %v1074_v21, %v1071_v63  ;;  %v1009_v49 = vmax.f32 %v1007_v2, 0.0  ;;  %v931_v46 = vadd.f32 %v927_v34, %v897_v58  ;;  %v926_v42 = vmul.f32 %v1979_v1, %v908_v28 }
 0x277   :  { %v976_v41 = vmax.f32 %v2105_v56, 0.0  ;;  %v960_v8 = vmul.f32 %v949_v33, %v942_v17  ;;  %v2135_v16 = vadd.f32 %v1040_v44, %v1038_v52  ;;  %v997_v55 = vadd.f32 %v993_v6, %v963_v11  ;;  %v1110_v56 = vld [vmem:[%s2216_s2 + $0x18] sm:$0xff] }
 0x278   :  { %v2249_v47 = vmov %v2248_v19  ;;  %v995_v2 = vmul.f32 %v987_v32, %v975_v20  ;;  %v1043_v29 = vmax.f32 %v1041_v53, 0.0  ;;  %v930_v13 = vadd.f32 %v926_v42, %v896_v60 }
 0x279   :  { %v961_v3 = vmul.f32 %v2021_v14, %v2249_v47  ;;  %v1010_v43 = vmax.f32 %v2127_v59, 0.0  ;;  %v1077_v15 = vmax.f32 %v1075_v37, 0.0  ;;  %v1072_v1 = vmul.f32 %v1070_v45, %v1820_v51  ;;  %v1108_v47 = vld [vmem:[%s2216_s2 + $0x8] sm:$0xff] }
 0x27a   :  { %v1017_v48 = vpop.permute.xlu1 %1016  ;;  %v1027_v63 = vmul.f32 %v1663_v61, %v1009_v49  ;;  %v964_v33 = vadd.f32 %v960_v8, %v930_v13  ;;  %v1044_v27 = vmax.f32 %v2135_v16, 0.0  ;;  %v1029_v38 = vmul.f32 %v1021_v54, %v1009_v49 }
 0x27b   :  { %v1051_v62 = vpop.permute.xlu0 %1050  ;;  %v965_v19 = vadd.f32 %v961_v3, %v931_v46  ;;  %v994_v20 = vmul.f32 %v2054_v4, %v976_v41  ;;  %v1028_v32 = vmul.f32 %v1017_v48, %v1010_v43  ;;  %v2149_v45 = vadd.f32 %v1074_v21, %v1072_v1  ;;  %v1107_v46 = vld [vmem:[%s2216_s2] sm:$0xff] }
 0x27c   :  { %v1031_v40 = vadd.f32 %v1027_v63, %v997_v55  ;;  %v1062_v37 = vmul.f32 %v1051_v62, %v1044_v27  ;;  %v1109_v62 = vld [vmem:[%s2216_s2 + $0x10] sm:$0xff]  ;;  %s1343_s2 = smov [#allocation7]  }
 0x27d   :  { %v999_v34 = vadd.f32 %v995_v2, %v965_v19  ;;  %v998_v44 = vadd.f32 %v994_v20, %v964_v33  ;;  %v1078_v4 = vmax.f32 %v2149_v45, 0.0 }
 0x27f   :  { %v1047_v24 = vpop.permute.xlu1 %1046  ;;  %v1033_v6 = vadd.f32 %v1029_v38, %v999_v34  ;;  %v1032_v60 = vadd.f32 %v1028_v32, %v998_v44 }
 0x280   :  { %v1061_v52 = vmul.f32 %v1047_v24, %v1043_v29  ;;  %v1081_v14 = vpop.permute.xlu0 %1080 }
 0x281   :  { %v1095_v51 = vmul.f32 %v1081_v14, %v1077_v15  ;;  %v1066_v8 = vadd.f32 %v1062_v37, %v1032_v60 }
 0x282   :  { %v1065_v61 = vadd.f32 %v1061_v52, %v1031_v40 }
 0x283   :  { %v1055_v11 = vpop.permute.xlu1 %1054 }
 0x284   :  { %v1099_v58 = vadd.f32 %v1095_v51, %v1065_v61  ;;  %v1063_v53 = vmul.f32 %v1055_v11, %v1043_v29  ;;  %v1089_v54 = vpop.permute.xlu0 %1088  ;;  %v2250_v61 = vmax.f32 %v1867_v7, 0.0  ;;  %v2251_v11 = vmax.f32 %v1892_v5, 0.0 }
 0x285   :  { %v1097_v49 = vmul.f32 %v1089_v54, %v1077_v15 }
 0x286   :  { %1103 = vst [vmem:[%s2221_s7] sm:$0xff] %v1099_v58  ;;  %v1067_v21 = vadd.f32 %v1063_v53, %v1033_v6  ;;  %v1111_v3 = vsub.f32 %v1099_v58, %v1107_v46  ;;  %v2252_v53 = vmax.f32 %v1906_v25, 0.0 }
 0x288   :  { %v1101_v48 = vadd.f32 %v1097_v49, %v1067_v21  ;;  %v1085_v42 = vpop.permute.xlu1 %1084  ;;  %v1115_v1 = vand.u32 2147483647, %v1111_v3 }
 0x289   :  { %v1096_v55 = vmul.f32 %v1085_v42, %v1078_v4 }
 0x28a   :  { %1105 = vst [vmem:[%s2221_s7 + $0x10] sm:$0xff] %v1101_v48  ;;  %v1113_v29 = vsub.f32 %v1101_v48, %v1109_v62 }
 0x28b   :  { %v1100_v2 = vadd.f32 %v1096_v55, %v1066_v8 }
 0x28c   :  { %v1117_v19 = vand.u32 2147483647, %v1113_v29 }
 0x28d   :  { %1104 = vst [vmem:[%s2221_s7 + $0x8] sm:$0xff] %v1100_v2  ;;  %v1112_v13 = vsub.f32 %v1100_v2, %v1108_v47  ;;  %v617_v15 = vpop.permute.xlu1 %616 }
 0x28e   :  { %v622_v44 = vmul.f32 %v617_v15, %v2250_v61 }
 0x28f   :  { %v1116_v63 = vand.u32 2147483647, %v1112_v13 }
 0x290   :  { %v626_v58 = vadd.f32 %v622_v44, %v2096_v10 }
 0x291   :  { %v1119_v33 = vadd.f32 %v1116_v63, %v1115_v1 }
 0x292   :  { %v651_v24 = vpop.permute.xlu1 %650 }
 0x293   :  { %v1120_v34 = vadd.f32 %v1119_v33, %v1117_v19  ;;  %v656_v6 = vmul.f32 %v651_v24, %v2251_v11 }
 0x295   :  { %v660_v37 = vadd.f32 %v656_v6, %v626_v58 }
 0x297   :  { %v685_v38 = vpop.permute.xlu1 %684 }
 0x298   :  { %v690_v54 = vmul.f32 %v685_v38, %v2252_v53 }
 0x29a   :  { %v694_v21 = vadd.f32 %v690_v54, %v660_v37 }
 0x29c   :  { %v719_v40 = vpop.permute.xlu1 %718 }
 0x29d   :  { %v724_v49 = vmul.f32 %v719_v40, %v704_v23 }
 0x29f   :  { %v728_v7 = vadd.f32 %v724_v49, %v694_v21 }
 0x2a1   :  { %v753_v52 = vpop.permute.xlu1 %752 }
 0x2a2   :  { %v758_v46 = vmul.f32 %v753_v52, %v738_v0 }
 0x2a4   :  { %v762_v42 = vadd.f32 %v758_v46, %v728_v7 }
 0x2a6   :  { %v787_v14 = vpop.permute.xlu1 %786 }
 0x2a7   :  { %v792_v5 = vmul.f32 %v787_v14, %v772_v50 }
 0x2a9   :  { %v796_v25 = vadd.f32 %v792_v5, %v762_v42 }
 0x2ab   :  { %v821_v20 = vpop.permute.xlu1 %820 }
 0x2ac   :  { %v826_v10 = vmul.f32 %v821_v20, %v806_v35 }
 0x2ae   :  { %v830_v36 = vadd.f32 %v826_v10, %v796_v25 }
 0x2b0   :  { %v855_v32 = vpop.permute.xlu1 %854 }
 0x2b1   :  { %v860_v8 = vmul.f32 %v855_v32, %v840_v18 }
 0x2b3   :  { %v864_v57 = vadd.f32 %v860_v8, %v830_v36 }
 0x2b5   :  { %v889_v51 = vpop.permute.xlu1 %888 }
 0x2b6   :  { %v894_v23 = vmul.f32 %v889_v51, %v874_v12 }
 0x2b8   :  { %v898_v9 = vadd.f32 %v894_v23, %v864_v57 }
 0x2ba   :  { %v923_v60 = vpop.permute.xlu1 %922 }
 0x2bb   :  { %v928_v0 = vmul.f32 %v923_v60, %v908_v28 }
 0x2bd   :  { %v932_v39 = vadd.f32 %v928_v0, %v898_v9 }
 0x2bf   :  { %v957_v48 = vpop.permute.xlu1 %956 }
 0x2c0   :  { %v962_v50 = vmul.f32 %v957_v48, %v942_v17 }
 0x2c2   :  { %v966_v31 = vadd.f32 %v962_v50, %v932_v39 }
 0x2c4   :  { %v991_v55 = vpop.permute.xlu1 %990 }
 0x2c5   :  { %v996_v35 = vmul.f32 %v991_v55, %v976_v41 }
 0x2c7   :  { %v1000_v30 = vadd.f32 %v996_v35, %v966_v31 }
 0x2c9   :  { %v1025_v62 = vpop.permute.xlu1 %1024 }
 0x2ca   :  { %v1030_v18 = vmul.f32 %v1025_v62, %v1010_v43 }
 0x2cc   :  { %v1034_v26 = vadd.f32 %v1030_v18, %v1000_v30 }
 0x2ce   :  { %v1059_v47 = vpop.permute.xlu1 %1058 }
 0x2cf   :  { %v1064_v12 = vmul.f32 %v1059_v47, %v1044_v27 }
 0x2d1   :  { %v1068_v3 = vadd.f32 %v1064_v12, %v1034_v26 }
 0x2d3   :  { %v1093_v28 = vpop.permute.xlu1 %1092 }
 0x2d4   :  { %v1098_v22 = vmul.f32 %v1093_v28, %v1078_v4 }
 0x2d6   :  { %v1102_v17 = vadd.f32 %v1098_v22, %v1068_v3 }
 0x2d8   :  { %1106 = vst [vmem:[%s2221_s7 + $0x18] sm:$0xff] %v1102_v17  ;;  %v1114_v59 = vsub.f32 %v1102_v17, %v1110_v56 }
 0x2da   :  { %v1118_v41 = vand.u32 2147483647, %v1114_v59 }
 0x2dc   :  { %v1121_v43 = vadd.f32 %v1120_v34, %v1118_v41 }
 0x2de   :  { %1122 = vadd.xlane.f32.xlu0 %v1121_v43 }
 0x367   :  { %v1123_v16 = vpop.xlane.xlu0 %1122 }
 0x368   :  { %v1124_v27 = vrot.slane %v1123_v16, 4 }
 0x36a   :  { %v1125_v2 = vadd.f32 %v1124_v27, %v1123_v16 }
 0x36c   :  { %v1126_v29 = vrot.slane %v1125_v2, 2 }
 0x36e   :  { %v1127_v13 = vadd.f32 %v1126_v29, %v1125_v2 }
 0x370   :  { %v1128_v45 = vrot.slane %v1127_v13, 1 }
 0x372   :  { %v1129_v4 = vadd.f32 %v1128_v45, %v1127_v13 }
 0x374   :  { %1186 = vpush %v1129_v4 }
 0x3a5   :  { %s1187_s1 = spop %1186 }
 0x3a6   :  { %1132 = sst [smem:[#allocation7]] %s1187_s1 }
 0x3a7   :  { %1142 = dma.smem_to_hbm %s1343_s2, 16, %s2222_s8, [#allocation3]  }
 0x3a8   :  { %1322 = dma.done.wait [#allocation3], 16  }
 0x3a9   :  { %1323 = vsyncadd [#allocation3], 4294967280 }
 0x3aa   :  { %1148 = sfence }
 0x3ab   :  { %1149 = vsyncpa [#allocation3], 1 }
 0x3ac   :  { %1150 = vsyncpa [#allocation4], 1 }
 0x3ad   :  { %1151 = vsyncpa [#allocation6], 1 }

</bundles_post_ra>
